<compile_context>
chip_gen: v7x
topology: tpu7x:2x2x1
jax: 0.10.0
libtpu: 0.0.40
codegen_flags: <defaults>
</compile_context>

<pallas_src>
import math
import jax
import jax.numpy as jnp
from jax.experimental import pallas as pl
from jax.experimental.pallas import tpu as pltpu

L1 = 400
L2 = 300
_LN_EPS = 1e-5  # PyTorch nn.LayerNorm default


def _elu(x):
    # ELU, alpha=1.0 (F.elu default). exp goes to the EUP; where selects x for
    # x>0 so the inf from exp(large x) never propagates.
    return jnp.where(x > 0.0, x, jnp.exp(x) - 1.0)


def _layernorm(x, gamma, beta):
    mu = jnp.mean(x, axis=-1, keepdims=True)
    d = x - mu
    var = jnp.mean(d * d, axis=-1, keepdims=True)  # biased var, matches torch
    return d * jax.lax.rsqrt(var + _LN_EPS) * gamma + beta


def critic_kernel(obs_ref, act_ref,
                  w1o_ref, w1a_ref, b1_ref, g1_ref, be1_ref,
                  w2_ref, b2_ref, g2_ref, be2_ref,
                  w3_ref, b3_ref,
                  out_ref):
    """One head per grid step (h in {Q1, Q2, V}): Linear->ELU->LN x2 -> dot(.,w3)."""
    obs = obs_ref[...].astype(jnp.bfloat16)
    act = act_ref[...].astype(jnp.bfloat16)

    # Layer 1 (concat folded: state @ W1 == obs @ W1_obs + act @ W1_act).
    h = (jnp.dot(obs, w1o_ref[0], preferred_element_type=jnp.float32)
         + jnp.dot(act, w1a_ref[0], preferred_element_type=jnp.float32)
         + b1_ref[0])
    h = _layernorm(_elu(h), g1_ref[0], be1_ref[0])

    # Layer 2.
    h = jnp.dot(h.astype(jnp.bfloat16), w2_ref[0],
                preferred_element_type=jnp.float32) + b2_ref[0]
    h = _layernorm(_elu(h), g2_ref[0], be2_ref[0])

    # Output layer (L2 -> 1): VPU multiply + lane reduce (no N=1 MXU matmul).
    q = jnp.sum(h * w3_ref[0], axis=-1, keepdims=True) + b3_ref[0]
    out_ref[0] = q.astype(out_ref.dtype)


def critic_forward(params, obs, action):
    """Pallas equivalent of Critic.forward(obs, action) -> (Q1, Q2, V)."""
    B = obs.shape[0]
    sd = params["state_dim"]
    ad = params["action_dim"]
    (w1o, w1a, b1, g1, be1, w2, b2, g2, be2, w3, b3) = params["packed"]

    head_blk = lambda h: (h, 0, 0)
    const_blk = lambda h: (0, 0)

    out = pl.pallas_call(
        critic_kernel,
        out_shape=jax.ShapeDtypeStruct((3, B, 1), jnp.float32),
        grid=(3,),
        in_specs=[
            pl.BlockSpec((B, sd), const_blk),          # obs   (VMEM-resident)
            pl.BlockSpec((B, ad), const_blk),          # action
            pl.BlockSpec((1, sd, L1), head_blk),       # W1 obs part   (bf16)
            pl.BlockSpec((1, ad, L1), head_blk),       # W1 act part   (bf16)
            pl.BlockSpec((1, 1, L1), head_blk),        # b1
            pl.BlockSpec((1, 1, L1), head_blk),        # LN1 gamma
            pl.BlockSpec((1, 1, L1), head_blk),        # LN1 beta
            pl.BlockSpec((1, L1, L2), head_blk),       # W2            (bf16)
            pl.BlockSpec((1, 1, L2), head_blk),        # b2
            pl.BlockSpec((1, 1, L2), head_blk),        # LN2 gamma
            pl.BlockSpec((1, 1, L2), head_blk),        # LN2 beta
            pl.BlockSpec((1, 1, L2), head_blk),        # w3 (as a row)
            pl.BlockSpec((1, 1, 1), head_blk),         # b3
        ],
        out_specs=pl.BlockSpec((1, B, 1), head_blk),
        compiler_params=pltpu.CompilerParams(
            dimension_semantics=("parallel",)),        # 2nd TC on v7x
    )(obs, action, w1o, w1a, b1, g1, be1, w2, b2, g2, be2, w3, b3)

    return out[0], out[1], out[2]


# ---------------------------------------------------------------------------
# Parameter init (PyTorch nn.Linear / nn.LayerNorm defaults) + packing.
# ---------------------------------------------------------------------------

def _init_linear(key, fan_in, fan_out):
    """nn.Linear default init: U(-1/sqrt(fan_in), 1/sqrt(fan_in)); stored (in, out)."""
    kw, kb = jax.random.split(key)
    bound = 1.0 / math.sqrt(fan_in)
    w = jax.random.uniform(kw, (fan_in, fan_out), jnp.float32, -bound, bound)
    b = jax.random.uniform(kb, (1, fan_out), jnp.float32, -bound, bound)
    return w, b


def _init_head(key, in_dim):
    k1, k2, k3 = jax.random.split(key, 3)
    w1, b1 = _init_linear(k1, in_dim, L1)
    w2, b2 = _init_linear(k2, L1, L2)
    w3, b3 = _init_linear(k3, L2, 1)
    return dict(w1=w1, b1=b1, g1=jnp.ones((1, L1), jnp.float32),
                be1=jnp.zeros((1, L1), jnp.float32),
                w2=w2, b2=b2, g2=jnp.ones((1, L2), jnp.float32),
                be2=jnp.zeros((1, L2), jnp.float32),
                w3=w3, b3=b3)


def _pack_params(raw, state_dim, action_dim):
    heads = [raw["q1"], raw["q2"], raw["v"]]
    stack = lambda fn: jnp.stack([fn(h) for h in heads], axis=0)

    # Layer-1 weight split into obs / action parts; V has no action input,
    # so its action part is zero (mathematically identical to the original).
    w1o = stack(lambda h: h["w1"][:state_dim]).astype(jnp.bfloat16)       # (3, sd, L1)
    w1a = jnp.stack([raw["q1"]["w1"][state_dim:],
                     raw["q2"]["w1"][state_dim:],
                     jnp.zeros((action_dim, L1), jnp.float32)],
                    axis=0).astype(jnp.bfloat16)                          # (3, ad, L1)
    b1 = stack(lambda h: h["b1"])                                         # (3, 1, L1)
    g1 = stack(lambda h: h["g1"])
    be1 = stack(lambda h: h["be1"])
    w2 = stack(lambda h: h["w2"]).astype(jnp.bfloat16)                    # (3, L1, L2)
    b2 = stack(lambda h: h["b2"])
    g2 = stack(lambda h: h["g2"])
    be2 = stack(lambda h: h["be2"])
    w3 = stack(lambda h: h["w3"].T)                                       # (3, 1, L2) f32
    b3 = stack(lambda h: h["b3"])                                         # (3, 1, 1)  f32
    return (w1o, w1a, b1, g1, be1, w2, b2, g2, be2, w3, b3)


def init_critic_params(key, state_dim, action_dim):
    kq1, kq2, kv = jax.random.split(key, 3)
    raw = {"q1": _init_head(kq1, state_dim + action_dim),
           "q2": _init_head(kq2, state_dim + action_dim),
           "v": _init_head(kv, state_dim)}
    return {"raw": raw,
            "packed": _pack_params(raw, state_dim, action_dim),
            "state_dim": state_dim,
            "action_dim": action_dim}


if __name__ == "__main__":
    batch = 8
    state_dim = 16
    action_dim = 8

    key = jax.random.PRNGKey(0)
    k_obs, k_act, k_params = jax.random.split(key, 3)

    obs = jax.random.normal(k_obs, (batch, state_dim), jnp.float32)
    action = jax.random.normal(k_act, (batch, action_dim), jnp.float32)
    params = init_critic_params(k_params, state_dim, action_dim)

    q1, q2, v = critic_forward(params, obs, action)
    jax.block_until_ready((q1, q2, v))

    assert q1.shape == (batch, 1)
    assert q2.shape == (batch, 1)
    assert v.shape == (batch, 1)

    # Pure-JAX f32 reference (PyTorch semantics).  Tolerance is loosened vs the
    # previous version because the kernel's matmuls run in bf16 (f32 accum).
    def _ref_head(x, p):
        def ln(h, g, b):
            mu = jnp.mean(h, -1, keepdims=True)
            var = jnp.mean((h - mu) ** 2, -1, keepdims=True)
            return (h - mu) / jnp.sqrt(var + _LN_EPS) * g + b

        def elu(h):
            return jnp.where(h > 0, h, jnp.exp(h) - 1.0)

        h = ln(elu(x @ p["w1"] + p["b1"]), p["g1"], p["be1"])
        h = ln(elu(h @ p["w2"] + p["b2"]), p["g2"], p["be2"])
        return h @ p["w3"] + p["b3"]

    state = jnp.concatenate([obs, action], axis=1)
    raw = params["raw"]
    assert jnp.allclose(q1, _ref_head(state, raw["q1"]), atol=2e-2, rtol=2e-2)
    assert jnp.allclose(q2, _ref_head(state, raw["q2"]), atol=2e-2, rtol=2e-2)
    assert jnp.allclose(v, _ref_head(obs, raw["v"]), atol=2e-2, rtol=2e-2)

    print("KERNEL_OK")
</pallas_src>

<mosaic_0001>
module attributes {stable_mosaic.version = 11 : i64} {
  func.func @critic_kernel(%arg0: i32, %arg1: memref<8x16xf32, #tpu.memory_space<vmem>>, %arg2: memref<8x8xf32, #tpu.memory_space<vmem>>, %arg3: memref<1x16x400xbf16, #tpu.memory_space<vmem>>, %arg4: memref<1x8x400xbf16, #tpu.memory_space<vmem>>, %arg5: memref<1x1x400xf32, #tpu.memory_space<vmem>>, %arg6: memref<1x1x400xf32, #tpu.memory_space<vmem>>, %arg7: memref<1x1x400xf32, #tpu.memory_space<vmem>>, %arg8: memref<1x400x300xbf16, #tpu.memory_space<vmem>>, %arg9: memref<1x1x300xf32, #tpu.memory_space<vmem>>, %arg10: memref<1x1x300xf32, #tpu.memory_space<vmem>>, %arg11: memref<1x1x300xf32, #tpu.memory_space<vmem>>, %arg12: memref<1x1x300xf32, #tpu.memory_space<vmem>>, %arg13: memref<1x1x1xf32, #tpu.memory_space<vmem>>, %arg14: memref<1x8x1xf32, #tpu.memory_space<vmem>>) attributes {dimension_semantics = [#tpu.dimension_semantics<parallel>], iteration_bounds = array<i64: 3>, scalar_prefetch = 0 : i64, scratch_operands = 0 : i64, tpu.core_type = #tpu.core_type<tc>, window_params = [{pipeline_mode = #tpu.pipeline_mode<synchronous>, transform_indices = @transform_0, window_bounds = array<i64: 8, 16>}, {pipeline_mode = #tpu.pipeline_mode<synchronous>, transform_indices = @transform_1, window_bounds = array<i64: 8, 8>}, {transform_indices = @transform_2, window_bounds = array<i64: 1, 16, 400>}, {transform_indices = @transform_3, window_bounds = array<i64: 1, 8, 400>}, {transform_indices = @transform_4, window_bounds = array<i64: 1, 1, 400>}, {transform_indices = @transform_5, window_bounds = array<i64: 1, 1, 400>}, {transform_indices = @transform_6, window_bounds = array<i64: 1, 1, 400>}, {transform_indices = @transform_7, window_bounds = array<i64: 1, 400, 300>}, {transform_indices = @transform_8, window_bounds = array<i64: 1, 1, 300>}, {transform_indices = @transform_9, window_bounds = array<i64: 1, 1, 300>}, {transform_indices = @transform_10, window_bounds = array<i64: 1, 1, 300>}, {transform_indices = @transform_11, window_bounds = array<i64: 1, 1, 300>}, {transform_indices = @transform_12, window_bounds = array<i64: 1, 1, 1>}, {transform_indices = @transform_13, window_bounds = array<i64: 1, 8, 1>}]} {
    %c0 = arith.constant 0 : index
    %c0_0 = arith.constant 0 : index
    %0 = vector.load %arg1[%c0, %c0_0] : memref<8x16xf32, #tpu.memory_space<vmem>>, vector<8x16xf32>
    %1 = arith.truncf %0 : vector<8x16xf32> to vector<8x16xbf16>
    %c0_1 = arith.constant 0 : index
    %c0_2 = arith.constant 0 : index
    %2 = vector.load %arg2[%c0_1, %c0_2] : memref<8x8xf32, #tpu.memory_space<vmem>>, vector<8x8xf32>
    %3 = arith.truncf %2 : vector<8x8xf32> to vector<8x8xbf16>
    %c0_3 = arith.constant 0 : index
    %c0_4 = arith.constant 0 : index
    %c0_5 = arith.constant 0 : index
    %4 = vector.load %arg3[%c0_3, %c0_4, %c0_5] : memref<1x16x400xbf16, #tpu.memory_space<vmem>>, vector<1x16x400xbf16>
    %5 = vector.shape_cast %4 : vector<1x16x400xbf16> to vector<16x400xbf16>
    %cst = arith.constant dense<0.000000e+00> : vector<8x400xf32>
    %6 = tpu.matmul %1, %5, %cst {dimension_numbers = #tpu.dot_dimension_numbers<[1], [0], [0], [1], [0, 0, 1, 1], [], []>} : vector<8x16xbf16>, vector<16x400xbf16>, vector<8x400xf32> -> vector<8x400xf32>
    %c0_6 = arith.constant 0 : index
    %c0_7 = arith.constant 0 : index
    %c0_8 = arith.constant 0 : index
    %7 = vector.load %arg4[%c0_6, %c0_7, %c0_8] : memref<1x8x400xbf16, #tpu.memory_space<vmem>>, vector<1x8x400xbf16>
    %8 = vector.shape_cast %7 : vector<1x8x400xbf16> to vector<8x400xbf16>
    %cst_9 = arith.constant dense<0.000000e+00> : vector<8x400xf32>
    %9 = tpu.matmul %3, %8, %cst_9 {dimension_numbers = #tpu.dot_dimension_numbers<[1], [0], [0], [1], [0, 0, 1, 1], [], []>} : vector<8x8xbf16>, vector<8x400xbf16>, vector<8x400xf32> -> vector<8x400xf32>
    %10 = arith.addf %6, %9 : vector<8x400xf32>
    %c0_10 = arith.constant 0 : index
    %c0_11 = arith.constant 0 : index
    %c0_12 = arith.constant 0 : index
    %11 = vector.load %arg5[%c0_10, %c0_11, %c0_12] : memref<1x1x400xf32, #tpu.memory_space<vmem>>, vector<1x1x400xf32>
    %12 = vector.shape_cast %11 : vector<1x1x400xf32> to vector<1x400xf32>
    %13 = vector.broadcast %12 : vector<1x400xf32> to vector<8x400xf32>
    %14 = arith.addf %10, %13 : vector<8x400xf32>
    %cst_13 = arith.constant 0.000000e+00 : f32
    %15 = vector.broadcast %cst_13 : f32 to vector<8x400xf32>
    %16 = arith.cmpf ogt, %14, %15 : vector<8x400xf32>
    %17 = math.exp %14 : vector<8x400xf32>
    %cst_14 = arith.constant 1.000000e+00 : f32
    %18 = vector.broadcast %cst_14 : f32 to vector<8x400xf32>
    %19 = arith.subf %17, %18 : vector<8x400xf32>
    %20 = arith.select %16, %14, %19 : vector<8x400xi1>, vector<8x400xf32>
    %c0_15 = arith.constant 0 : index
    %c0_16 = arith.constant 0 : index
    %c0_17 = arith.constant 0 : index
    %21 = vector.load %arg6[%c0_15, %c0_16, %c0_17] : memref<1x1x400xf32, #tpu.memory_space<vmem>>, vector<1x1x400xf32>
    %22 = vector.shape_cast %21 : vector<1x1x400xf32> to vector<1x400xf32>
    %c0_18 = arith.constant 0 : index
    %c0_19 = arith.constant 0 : index
    %c0_20 = arith.constant 0 : index
    %23 = vector.load %arg7[%c0_18, %c0_19, %c0_20] : memref<1x1x400xf32, #tpu.memory_space<vmem>>, vector<1x1x400xf32>
    %24 = vector.shape_cast %23 : vector<1x1x400xf32> to vector<1x400xf32>
    %cst_21 = arith.constant dense<0.000000e+00> : vector<8xf32>
    %25 = vector.multi_reduction <add>, %20, %cst_21 [1] : vector<8x400xf32> to vector<8xf32>
    %26 = vector.shape_cast %25 : vector<8xf32> to vector<8x1xf32>
    %cst_22 = arith.constant 4.000000e+02 : f32
    %27 = vector.broadcast %cst_22 : f32 to vector<8x1xf32>
    %28 = arith.divf %26, %27 : vector<8x1xf32>
    %29 = vector.broadcast %28 : vector<8x1xf32> to vector<8x400xf32>
    %30 = arith.subf %20, %29 : vector<8x400xf32>
    %31 = arith.mulf %30, %30 : vector<8x400xf32>
    %cst_23 = arith.constant dense<0.000000e+00> : vector<8xf32>
    %32 = vector.multi_reduction <add>, %31, %cst_23 [1] : vector<8x400xf32> to vector<8xf32>
    %33 = vector.shape_cast %32 : vector<8xf32> to vector<8x1xf32>
    %cst_24 = arith.constant 4.000000e+02 : f32
    %34 = vector.broadcast %cst_24 : f32 to vector<8x1xf32>
    %35 = arith.divf %33, %34 : vector<8x1xf32>
    %cst_25 = arith.constant 9.99999974E-6 : f32
    %36 = vector.broadcast %cst_25 : f32 to vector<8x1xf32>
    %37 = arith.addf %35, %36 : vector<8x1xf32>
    %38 = math.rsqrt %37 : vector<8x1xf32>
    %39 = vector.broadcast %38 : vector<8x1xf32> to vector<8x400xf32>
    %40 = arith.mulf %30, %39 : vector<8x400xf32>
    %41 = vector.broadcast %22 : vector<1x400xf32> to vector<8x400xf32>
    %42 = arith.mulf %40, %41 : vector<8x400xf32>
    %43 = vector.broadcast %24 : vector<1x400xf32> to vector<8x400xf32>
    %44 = arith.addf %42, %43 : vector<8x400xf32>
    %45 = arith.truncf %44 : vector<8x400xf32> to vector<8x400xbf16>
    %c0_26 = arith.constant 0 : index
    %c0_27 = arith.constant 0 : index
    %c0_28 = arith.constant 0 : index
    %46 = vector.load %arg8[%c0_26, %c0_27, %c0_28] : memref<1x400x300xbf16, #tpu.memory_space<vmem>>, vector<1x400x300xbf16>
    %47 = vector.shape_cast %46 : vector<1x400x300xbf16> to vector<400x300xbf16>
    %cst_29 = arith.constant dense<0.000000e+00> : vector<8x300xf32>
    %48 = tpu.matmul %45, %47, %cst_29 {dimension_numbers = #tpu.dot_dimension_numbers<[1], [0], [0], [1], [0, 0, 1, 1], [], []>} : vector<8x400xbf16>, vector<400x300xbf16>, vector<8x300xf32> -> vector<8x300xf32>
    %c0_30 = arith.constant 0 : index
    %c0_31 = arith.constant 0 : index
    %c0_32 = arith.constant 0 : index
    %49 = vector.load %arg9[%c0_30, %c0_31, %c0_32] : memref<1x1x300xf32, #tpu.memory_space<vmem>>, vector<1x1x300xf32>
    %50 = vector.shape_cast %49 : vector<1x1x300xf32> to vector<1x300xf32>
    %51 = vector.broadcast %50 : vector<1x300xf32> to vector<8x300xf32>
    %52 = arith.addf %48, %51 : vector<8x300xf32>
    %cst_33 = arith.constant 0.000000e+00 : f32
    %53 = vector.broadcast %cst_33 : f32 to vector<8x300xf32>
    %54 = arith.cmpf ogt, %52, %53 : vector<8x300xf32>
    %55 = math.exp %52 : vector<8x300xf32>
    %cst_34 = arith.constant 1.000000e+00 : f32
    %56 = vector.broadcast %cst_34 : f32 to vector<8x300xf32>
    %57 = arith.subf %55, %56 : vector<8x300xf32>
    %58 = arith.select %54, %52, %57 : vector<8x300xi1>, vector<8x300xf32>
    %c0_35 = arith.constant 0 : index
    %c0_36 = arith.constant 0 : index
    %c0_37 = arith.constant 0 : index
    %59 = vector.load %arg10[%c0_35, %c0_36, %c0_37] : memref<1x1x300xf32, #tpu.memory_space<vmem>>, vector<1x1x300xf32>
    %60 = vector.shape_cast %59 : vector<1x1x300xf32> to vector<1x300xf32>
    %c0_38 = arith.constant 0 : index
    %c0_39 = arith.constant 0 : index
    %c0_40 = arith.constant 0 : index
    %61 = vector.load %arg11[%c0_38, %c0_39, %c0_40] : memref<1x1x300xf32, #tpu.memory_space<vmem>>, vector<1x1x300xf32>
    %62 = vector.shape_cast %61 : vector<1x1x300xf32> to vector<1x300xf32>
    %cst_41 = arith.constant dense<0.000000e+00> : vector<8xf32>
    %63 = vector.multi_reduction <add>, %58, %cst_41 [1] : vector<8x300xf32> to vector<8xf32>
    %64 = vector.shape_cast %63 : vector<8xf32> to vector<8x1xf32>
    %cst_42 = arith.constant 3.000000e+02 : f32
    %65 = vector.broadcast %cst_42 : f32 to vector<8x1xf32>
    %66 = arith.divf %64, %65 : vector<8x1xf32>
    %67 = vector.broadcast %66 : vector<8x1xf32> to vector<8x300xf32>
    %68 = arith.subf %58, %67 : vector<8x300xf32>
    %69 = arith.mulf %68, %68 : vector<8x300xf32>
    %cst_43 = arith.constant dense<0.000000e+00> : vector<8xf32>
    %70 = vector.multi_reduction <add>, %69, %cst_43 [1] : vector<8x300xf32> to vector<8xf32>
    %71 = vector.shape_cast %70 : vector<8xf32> to vector<8x1xf32>
    %cst_44 = arith.constant 3.000000e+02 : f32
    %72 = vector.broadcast %cst_44 : f32 to vector<8x1xf32>
    %73 = arith.divf %71, %72 : vector<8x1xf32>
    %cst_45 = arith.constant 9.99999974E-6 : f32
    %74 = vector.broadcast %cst_45 : f32 to vector<8x1xf32>
    %75 = arith.addf %73, %74 : vector<8x1xf32>
    %76 = math.rsqrt %75 : vector<8x1xf32>
    %77 = vector.broadcast %76 : vector<8x1xf32> to vector<8x300xf32>
    %78 = arith.mulf %68, %77 : vector<8x300xf32>
    %79 = vector.broadcast %60 : vector<1x300xf32> to vector<8x300xf32>
    %80 = arith.mulf %78, %79 : vector<8x300xf32>
    %81 = vector.broadcast %62 : vector<1x300xf32> to vector<8x300xf32>
    %82 = arith.addf %80, %81 : vector<8x300xf32>
    %c0_46 = arith.constant 0 : index
    %c0_47 = arith.constant 0 : index
    %c0_48 = arith.constant 0 : index
    %83 = vector.load %arg12[%c0_46, %c0_47, %c0_48] : memref<1x1x300xf32, #tpu.memory_space<vmem>>, vector<1x1x300xf32>
    %84 = vector.shape_cast %83 : vector<1x1x300xf32> to vector<1x300xf32>
    %85 = vector.broadcast %84 : vector<1x300xf32> to vector<8x300xf32>
    %86 = arith.mulf %82, %85 : vector<8x300xf32>
    %cst_49 = arith.constant dense<0.000000e+00> : vector<8xf32>
    %87 = vector.multi_reduction <add>, %86, %cst_49 [1] : vector<8x300xf32> to vector<8xf32>
    %88 = vector.shape_cast %87 : vector<8xf32> to vector<8x1xf32>
    %c0_50 = arith.constant 0 : index
    %c0_51 = arith.constant 0 : index
    %c0_52 = arith.constant 0 : index
    %89 = vector.load %arg13[%c0_50, %c0_51, %c0_52] : memref<1x1x1xf32, #tpu.memory_space<vmem>>, vector<1x1x1xf32>
    %90 = vector.shape_cast %89 : vector<1x1x1xf32> to vector<1x1xf32>
    %91 = vector.broadcast %90 : vector<1x1xf32> to vector<8x1xf32>
    %92 = arith.addf %88, %91 : vector<8x1xf32>
    %c0_53 = arith.constant 0 : index
    %c0_54 = arith.constant 0 : index
    %c0_55 = arith.constant 0 : index
    %93 = vector.load %arg14[%c0_53, %c0_54, %c0_55] : memref<1x8x1xf32, #tpu.memory_space<vmem>>, vector<1x8x1xf32>
    %94 = vector.shape_cast %93 : vector<1x8x1xf32> to vector<8x1xf32>
    %95 = vector.shape_cast %92 : vector<8x1xf32> to vector<1x8x1xf32>
    tpu.vector_store %arg14[%c0_53, %c0_54, %c0_55], %95 {strides = array<i32>} : memref<1x8x1xf32, #tpu.memory_space<vmem>>, vector<1x8x1xf32>,
    return
  }
  func.func @transform_0(%arg0: i32) -> (i32, i32) {
    %c0_i32 = arith.constant 0 : i32
    %c0_i32_0 = arith.constant 0 : i32
    %c0_i32_1 = arith.constant 0 : i32
    return %c0_i32, %c0_i32_0 : i32, i32
  }
  func.func @transform_1(%arg0: i32) -> (i32, i32) {
    %c0_i32 = arith.constant 0 : i32
    %c0_i32_0 = arith.constant 0 : i32
    %c0_i32_1 = arith.constant 0 : i32
    return %c0_i32, %c0_i32_0 : i32, i32
  }
  func.func @transform_2(%arg0: i32) -> (i32, i32, i32) {
    %c0_i32 = arith.constant 0 : i32
    %c0_i32_0 = arith.constant 0 : i32
    %c0_i32_1 = arith.constant 0 : i32
    return %arg0, %c0_i32, %c0_i32_0 : i32, i32, i32
  }
  func.func @transform_3(%arg0: i32) -> (i32, i32, i32) {
    %c0_i32 = arith.constant 0 : i32
    %c0_i32_0 = arith.constant 0 : i32
    %c0_i32_1 = arith.constant 0 : i32
    return %arg0, %c0_i32, %c0_i32_0 : i32, i32, i32
  }
  func.func @transform_4(%arg0: i32) -> (i32, i32, i32) {
    %c0_i32 = arith.constant 0 : i32
    %c0_i32_0 = arith.constant 0 : i32
    %c0_i32_1 = arith.constant 0 : i32
    return %arg0, %c0_i32, %c0_i32_0 : i32, i32, i32
  }
  func.func @transform_5(%arg0: i32) -> (i32, i32, i32) {
    %c0_i32 = arith.constant 0 : i32
    %c0_i32_0 = arith.constant 0 : i32
    %c0_i32_1 = arith.constant 0 : i32
    return %arg0, %c0_i32, %c0_i32_0 : i32, i32, i32
  }
  func.func @transform_6(%arg0: i32) -> (i32, i32, i32) {
    %c0_i32 = arith.constant 0 : i32
    %c0_i32_0 = arith.constant 0 : i32
    %c0_i32_1 = arith.constant 0 : i32
    return %arg0, %c0_i32, %c0_i32_0 : i32, i32, i32
  }
  func.func @transform_7(%arg0: i32) -> (i32, i32, i32) {
    %c0_i32 = arith.constant 0 : i32
    %c0_i32_0 = arith.constant 0 : i32
    %c0_i32_1 = arith.constant 0 : i32
    return %arg0, %c0_i32, %c0_i32_0 : i32, i32, i32
  }
  func.func @transform_8(%arg0: i32) -> (i32, i32, i32) {
    %c0_i32 = arith.constant 0 : i32
    %c0_i32_0 = arith.constant 0 : i32
    %c0_i32_1 = arith.constant 0 : i32
    return %arg0, %c0_i32, %c0_i32_0 : i32, i32, i32
  }
  func.func @transform_9(%arg0: i32) -> (i32, i32, i32) {
    %c0_i32 = arith.constant 0 : i32
    %c0_i32_0 = arith.constant 0 : i32
    %c0_i32_1 = arith.constant 0 : i32
    return %arg0, %c0_i32, %c0_i32_0 : i32, i32, i32
  }
  func.func @transform_10(%arg0: i32) -> (i32, i32, i32) {
    %c0_i32 = arith.constant 0 : i32
    %c0_i32_0 = arith.constant 0 : i32
    %c0_i32_1 = arith.constant 0 : i32
    return %arg0, %c0_i32, %c0_i32_0 : i32, i32, i32
  }
  func.func @transform_11(%arg0: i32) -> (i32, i32, i32) {
    %c0_i32 = arith.constant 0 : i32
    %c0_i32_0 = arith.constant 0 : i32
    %c0_i32_1 = arith.constant 0 : i32
    return %arg0, %c0_i32, %c0_i32_0 : i32, i32, i32
  }
  func.func @transform_12(%arg0: i32) -> (i32, i32, i32) {
    %c0_i32 = arith.constant 0 : i32
    %c0_i32_0 = arith.constant 0 : i32
    %c0_i32_1 = arith.constant 0 : i32
    return %arg0, %c0_i32, %c0_i32_0 : i32, i32, i32
  }
  func.func @transform_13(%arg0: i32) -> (i32, i32, i32) {
    %c0_i32 = arith.constant 0 : i32
    %c0_i32_0 = arith.constant 0 : i32
    %c0_i32_1 = arith.constant 0 : i32
    return %arg0, %c0_i32, %c0_i32_0 : i32, i32, i32
  }
}

</mosaic_0001>

<bundles_post_ra>
// kernel: tpu_custom_call.1
= control target key start
LH: loop header
LB: loop body
LE: loop exit
PB: predicated region body
PF: predicated region fallthrough
CT: control target
= control target key end

     0   :  { %s3434_s0 = inlined_call_operand.hbm [shape: f32[8,16], index: 0, kind: input, shape index: {}]   ;;  %s3435_s1 = inlined_call_operand.hbm [shape: f32[8,8], index: 1, kind: input, shape index: {}]   ;;  %s3436_s2 = inlined_call_operand.hbm [shape: bf16[3,16,400], index: 2, kind: input, shape index: {}]   ;;  %s3437_s3 = inlined_call_operand.hbm [shape: bf16[3,8,400], index: 3, kind: input, shape index: {}]   ;;  %s3438_s4 = inlined_call_operand.vmem [shape: f32[3,1,400], index: 4, kind: input, shape index: {}]   ;;  %s3439_s5 = inlined_call_operand.hbm [shape: f32[3,1,400], index: 5, kind: input, shape index: {}]   ;;  %s3440_s6 = inlined_call_operand.vmem [shape: f32[3,1,400], index: 6, kind: input, shape index: {}]   ;;  %s3441_s7 = inlined_call_operand.hbm [shape: bf16[3,400,300], index: 7, kind: input, shape index: {}]   ;;  %s3442_s8 = inlined_call_operand.vmem [shape: f32[3,1,300], index: 8, kind: input, shape index: {}]   ;;  %s3443_s9 = inlined_call_operand.hbm [shape: f32[3,1,300], index: 9, kind: input, shape index: {}]   ;;  %s3444_s10 = inlined_call_operand.hbm [shape: f32[3,1,300], index: 10, kind: input, shape index: {}]   ;;  %s3445_s11 = inlined_call_operand.vmem [shape: f32[3,1,300], index: 11, kind: input, shape index: {}]   ;;  %s3446_s12 = inlined_call_operand.vmem [shape: f32[3,1,1], index: 12, kind: input, shape index: {}]   ;;  %s3447_s13 = inlined_call_operand.vmem [shape: f32[3,8,1], index: 13, kind: output, shape index: {}]  }
   0x1   :  { %3462 = sst [smem:[#allocation18_spill]] %s3434_s0 }
   0x2   :  { %3463 = sst [smem:[#allocation19_spill]] %s3436_s2 }
   0x3   :  { %3464 = sst [smem:[#allocation20_spill]] %s3437_s3 }
   0x4   :  { %3465 = sst [smem:[#allocation21_spill]] %s3442_s8 }
   0x5   :  { %3466 = sst [smem:[#allocation22_spill]] %s3445_s11 }
   0x6   :  { %3467 = sst [smem:[#allocation23_spill]] %s3446_s12 }
   0x7   :  { %3468 = sst [smem:[#allocation24_spill]] %s3447_s13 }
   0x8   :  { %18 = vsyncpa [#allocation3], 0 }
   0x9   :  { %19 = vsyncpa [#allocation5], 0  ;;  %s2884_s25 = smov 0   ;;  %s2886_s26 = smov 0  }
   0xa   :  { %s2888_s27 = smov 0   ;;  %s2890_s28 = smov 0  }
   0xb LB: > { %3469 = sst [smem:[#allocation15_spill]] %s2795_s27  ;;  %s2903_s29 = sadd.s32 4294967295, %s2799_s28   ;;  %s2799_s28 = sphi %s2890_s28, %s3499_s28   ;;  %s2795_s27 = sphi %s2888_s27, %s3501_s27   ;;  %s2791_s26 = sphi %s2886_s26, %s3503_s26   ;;  %s2787_s25 = sphi %s2884_s25, %s3502_s25  }
   0xc   : > { %s2906_s30 = sadd.s32 1, %s2799_s28   ;;  %s74_s15 = sadd.s32 1, %s2795_s27 }
   0xd   : > { %3470 = sst [smem:[#allocation16_spill]] %s2906_s30  ;;  %s71_s14 = ssub.s32 %s2799_s28, %s2906_s30 }
   0xe   : > { %p72_p0 = scmp.eq.s32.totalorder %s71_s14, 0  ;;  %p81_p1 = scmp.ne.s32.totalorder %s2795_s27, %s2791_s26 }
   0xf   : > { %p82_p2 = scmp.eq.s32.totalorder %s2799_s28, 0  ;;  %p87_p3 = scmp.ne.s32.totalorder %s2791_s26, %s2787_s25 }
  0x10   : > { %s2916_s16 = scalar_select %p72_p0, %s2795_s27, %s74_s15  }
  0x11   : > { %p2918_p4 = por %p82_p2, %p81_p1  ;;  %p3451_p5 = scmp.eq.s32.totalorder %s2903_s29, 0 }
  0x12   : > { %3471 = sst [smem:[#allocation17_spill]] %s2916_s16  ;;  %p2137_p6 = scmp.ge.s32.totalorder %s2799_s28, 1 }
  0x13   : > { %p384_p7 = scmp.lt.s32.totalorder %s2799_s28, 4  ;;  %p2927_p8 = por %p3451_p5, %p87_p3 }
  0x14   : > { %s2801_s20 = smov [#allocation2]   ;;  %p2351_p11 = scmp.lt.s32.totalorder %s2799_s28, 3 }
  0x15   : > { %s3473_s18 = scalar_select %p2927_p8, 1, 0 }
  0x16   : > { %p2931_p9 = pnand %p2137_p6, %p384_p7  ;;  %s397_s21 = sshll.u32 %s2801_s20, 4  ;;  %s398_s21 = int_to_ptr.vmem [resolvable:$true] %s397_s21 }
  0x17   : > { %s419_s22 = sand.u32 1, %s2799_s28   ;;  %p2947_p13 = pnand %p2351_p11, %p2918_p4 }
  0x18   : > { %s3474_s19 = scalar_select %p2931_p9, 1, 0 }
  0x19   : > { %p2323_p10 = pneg %p2931_p9  ;;  %s2952_s25 = sand.u32 1, %s2795_s27  }
  0x1a   : > { %s3476_s24 = scalar_select %p2947_p13, 1, 0 }
  0x1b   : > { %p2941_p12 = pnand %p2323_p10, %p3451_p5  ;;  %s2141_s14 = sshll.u32 %s2952_s25, 5 }
  0x1c   : > { %s3477_s0 = sld [smem:[#allocation18_spill]] }
  0x1d   : > { %s3475_s23 = scalar_select %p2941_p12, 1, 0 }
  0x1e   : > { %p3455_p1 = pneg %p2941_p12 }
  0x22   : > { %s2521_s16 = scalar_lea.hbm %s3477_s0, 128 }
  0x23   : > { %p2522_p0 = scmp.ne.s32.totalorder %s3477_s0, %s2521_s16  ;;  %p2528_p4 = scmp.lt.u32.totalorder %s2521_s16, %s3477_s0 }
  0x25   : > { %p2524_p2 = pnand %p3455_p1, %p2522_p0 }
  0x27   : > { %p2525_p3 = pneg %p2524_p2 }
  0x29   : > { %p2530_p6 = pnand %p2528_p4, %p2525_p3 }
  0x2b   : > { %2533 = shalt.err (!%p2530_p6)
}
  0x2c   : > { %s2534_s27 = scalar_lea.vmem %s398_s21, 128  ;;  %p2542_p5 = scmp.lt.s32.totalorder %s398_s21, %s398_s21 }
  0x2d   : > { %p2535_p7 = scmp.ne.s32.totalorder %s398_s21, %s2534_s27  ;;  %p2543_p8 = scmp.lt.s32.totalorder %s2534_s27, %s2534_s27 }
  0x2f   : > { %p2537_p10 = pnand %p2535_p7, %p3455_p1  ;;  %p2544_p9 = por %p2543_p8, %p2542_p5 }
  0x31   : > { %p2538_p11 = pneg %p2537_p10 }
  0x33   : > { %p2545_p13 = pnand %p2544_p9, %p2538_p11 }
  0x35   : > { %2548 = shalt.err (!%p2545_p13)
}
  0x36   : > { %2326 = dma.hbm_to_vmem [thread:$0]  (!%p2941_p12), %s3477_s0, 128, %s398_s21, [#allocation3]  }
  0x37   : > { %s2263_s12 = sshll.u32 %s2799_s28, 9  ;;  %s423_s16 = scalar_lea.vmem [#allocation6], %s2141_s14 }
  0x38   : > { %s430_s15 = sshll.u32 %s423_s16, 4  ;;  %s3478_s2 = sld [smem:[#allocation19_spill]]  ;;  %s2983_s15 = int_to_ptr.vmem [resolvable:$true] %s430_s15 }
  0x39   : > { %s2985_s27 = scalar_lea.sflag [#allocation3], %s419_s22  ;;  %p3479_p8 = scmp.ne.s32.totalorder %s3476_s24, 0 }
  0x3b   : > { %p2991_p9 = pneg %p3479_p8 }
  0x3d   : > { %s3480_s21 = scalar_select %p2991_p9, 1, 0 }
  0x3e   : > { %s2981_s11 = scalar_lea.hbm %s3478_s2, %s2263_s12  ;;  %s2554_s12 = scalar_lea.hbm %s3478_s2, 1536 }
  0x3f   : > { %s2549_s13 = scalar_lea.hbm %s2981_s11, 512  ;;  %p2555_p2 = scmp.lt.u32.totalorder %s2981_s11, %s3478_s2 }
  0x40   : > { %p2550_p5 = scmp.ne.s32.totalorder %s2981_s11, %s2549_s13  ;;  %p2556_p3 = scmp.lt.u32.totalorder %s2554_s12, %s2549_s13 }
  0x41   : > { %p2558_p6 = scmp.lt.u32.totalorder %s2549_s13, %s2981_s11 }
  0x42   : > { %p2552_p13 = pnand %p2991_p9, %p2550_p5  ;;  %p2557_p4 = por %p2556_p3, %p2555_p2 }
  0x44   : > { %p2553_p0 = pneg %p2552_p13  ;;  %p2559_p7 = por %p2558_p6, %p2557_p4 }
  0x46   : > { %p2560_p10 = pnand %p2559_p7, %p2553_p0 }
  0x48   : > { %2563 = shalt.err (!%p2560_p10)
}
  0x49   : > { %s2564_s22 = scalar_lea.vmem %s2983_s15, 512  ;;  %s2802_s17 = smov [#allocation6]  }
  0x4a   : > { %p2565_p11 = scmp.ne.s32.totalorder %s2983_s15, %s2564_s22  ;;  %s2569_s14 = sshll.u32 %s2802_s17, 4  ;;  %s2570_s14 = int_to_ptr.vmem [resolvable:$false] %s2569_s14 }
  0x4b   : > { %s2571_s30 = scalar_lea.vmem %s2570_s14, 1024  ;;  %p2572_p1 = scmp.lt.s32.totalorder %s2983_s15, %s2570_s14 }
  0x4c   : > { %p2567_p5 = pnand %p2565_p11, %p2991_p9  ;;  %p2573_p12 = scmp.lt.s32.totalorder %s2571_s30, %s2564_s22 }
  0x4e   : > { %p2568_p13 = pneg %p2567_p5  ;;  %p2574_p2 = por %p2573_p12, %p2572_p1 }
  0x50   : > { %p2575_p3 = pnand %p2574_p2, %p2568_p13 }
  0x52   : > { %2578 = shalt.err (!%p2575_p3)
}
  0x53   : > { %s2803_s13 = smov 256   ;;  %s2804_s12 = smov 16  }
  0x54   : > { %2333 = dma.hbm_to_vmem [thread:$0]  (!%p3479_p8), %s2981_s11, 512, %s2983_s15, %s2985_s27, %s2803_s13, %s2803_s13, %s2804_s12  }
  0x55   : > { %s2144_s16 = sshll.u32 %s2952_s25, 4  ;;  %s2264_s20 = sshll.u32 %s2799_s28, 8 }
  0x56   : > { %s3481_s3 = sld [smem:[#allocation20_spill]]  ;;  %s444_s30 = scalar_lea.vmem [#allocation7], %s2144_s16 }
  0x57   : > { %s452_s0 = sshll.u32 %s444_s30, 4  ;;  %s2147_s2 = sshll.u32 %s2952_s25, 2  ;;  %s453_s0 = int_to_ptr.vmem [resolvable:$true] %s452_s0 }
  0x5c   : > { %s3020_s22 = scalar_lea.hbm %s3481_s3, %s2264_s20  ;;  %s2584_s13 = scalar_lea.hbm %s3481_s3, 768 }
  0x5d   : > { %s2579_s8 = scalar_lea.hbm %s3020_s22, 256  ;;  %p2585_p4 = scmp.lt.u32.totalorder %s3020_s22, %s3481_s3 }
  0x5e   : > { %p2580_p12 = scmp.ne.s32.totalorder %s3020_s22, %s2579_s8  ;;  %p2586_p6 = scmp.lt.u32.totalorder %s2584_s13, %s2579_s8 }
  0x5f   : > { %p2588_p10 = scmp.lt.u32.totalorder %s2579_s8, %s3020_s22 }
  0x60   : > { %p2582_p1 = pnand %p2580_p12, %p2991_p9  ;;  %p2587_p7 = por %p2586_p6, %p2585_p4 }
  0x62   : > { %p2583_p0 = pneg %p2582_p1  ;;  %p2589_p11 = por %p2588_p10, %p2587_p7 }
  0x64   : > { %p2590_p5 = pnand %p2589_p11, %p2583_p0 }
  0x66   : > { %2593 = shalt.err (!%p2590_p5)
}
  0x67   : > { %s2594_s16 = scalar_lea.vmem %s453_s0, 256  ;;  %s2805_s17 = smov [#allocation7]  }
  0x68   : > { %p2595_p13 = scmp.ne.s32.totalorder %s453_s0, %s2594_s16  ;;  %s2599_s14 = sshll.u32 %s2805_s17, 4  ;;  %s2600_s14 = int_to_ptr.vmem [resolvable:$false] %s2599_s14 }
  0x69   : > { %s2601_s30 = scalar_lea.vmem %s2600_s14, 512  ;;  %p2602_p12 = scmp.lt.s32.totalorder %s453_s0, %s2600_s14 }
  0x6a   : > { %p2597_p2 = pnand %p2595_p13, %p2991_p9  ;;  %p2603_p1 = scmp.lt.s32.totalorder %s2601_s30, %s2594_s16 }
  0x6c   : > { %p2598_p3 = pneg %p2597_p2  ;;  %p2604_p8 = por %p2603_p1, %p2602_p12 }
  0x6e   : > { %p2605_p4 = pnand %p2604_p8, %p2598_p3 }
  0x70   : > { %2608 = shalt.err (!%p2605_p4)
}
  0x71   : > { %p3482_p6 = scmp.ne.s32.totalorder %s3476_s24, 0  ;;  %s2265_s8 = sshll.u32 %s2799_s28, 6 }
  0x72   : > { %s470_s11 = scalar_lea.vmem [#allocation8], %s2147_s2  ;;  %s476_s20 = scalar_lea.hbm %s3439_s5, %s2265_s8 }
  0x73   : > { %2336 = dma.hbm_to_vmem [thread:$0]  (!%p3482_p6), %s3020_s22, 256, %s453_s0, %s2985_s27  }
  0x74   : > { %s478_s15 = sshll.u32 %s470_s11, 4  ;;  %s2609_s16 = scalar_lea.hbm %s476_s20, 64  ;;  %s479_s15 = int_to_ptr.vmem [resolvable:$true] %s478_s15 }
  0x75   : > { %p2610_p8 = scmp.ne.s32.totalorder %s476_s20, %s2609_s16  ;;  %s2614_s30 = scalar_lea.hbm %s3439_s5, 192 }
  0x76   : > { %p2615_p10 = scmp.lt.u32.totalorder %s476_s20, %s3439_s5  ;;  %p2616_p11 = scmp.lt.u32.totalorder %s2614_s30, %s2609_s16 }
  0x77   : > { %p2612_p0 = pnand %p2610_p8, %p2991_p9  ;;  %p2618_p13 = scmp.lt.u32.totalorder %s2609_s16, %s476_s20 }
  0x78   : > { %p2617_p5 = por %p2616_p11, %p2615_p10 }
  0x79   : > { %p2613_p7 = pneg %p2612_p0 }
  0x7a   : > { %p2619_p2 = por %p2618_p13, %p2617_p5 }
  0x7c   : > { %p2620_p3 = pnand %p2619_p2, %p2613_p7 }
  0x7e   : > { %2623 = shalt.err (!%p2620_p3)
}
  0x7f   : > { %s2624_s2 = scalar_lea.vmem %s479_s15, 64  ;;  %s2806_s22 = smov [#allocation8]  }
  0x80   : > { %p2625_p12 = scmp.ne.s32.totalorder %s479_s15, %s2624_s2  ;;  %s2629_s8 = sshll.u32 %s2806_s22, 4  ;;  %s2630_s8 = int_to_ptr.vmem [resolvable:$false] %s2629_s8 }
  0x81   : > { %s2631_s11 = scalar_lea.vmem %s2630_s8, 128  ;;  %p2632_p8 = scmp.lt.s32.totalorder %s479_s15, %s2630_s8 }
  0x82   : > { %p2627_p1 = pnand %p2625_p12, %p2991_p9  ;;  %p2633_p0 = scmp.lt.s32.totalorder %s2631_s11, %s2624_s2 }
  0x84   : > { %p2628_p4 = pneg %p2627_p1  ;;  %p2634_p6 = por %p2633_p0, %p2632_p8 }
  0x86   : > { %p2635_p10 = pnand %p2634_p6, %p2628_p4 }
  0x88   : > { %2638 = shalt.err (!%p2635_p10)
}
  0x89   : > { %p3483_p11 = scmp.ne.s32.totalorder %s3476_s24, 0  ;;  %s2294_s3 = smul.u32 600, %s2952_s25 }
  0x8a   : > { %s2295_s13 = smul.u32 9600, %s2799_s28  ;;  %s2644_s22 = scalar_lea.hbm %s3441_s7, 28800 }
  0x8b   : > { %2339 = dma.hbm_to_vmem [thread:$0]  (!%p3483_p11), %s476_s20, 64, %s479_s15, %s2985_s27  }
  0x8c   : > { %s2296_s12 = smul.u32 3, %s2952_s25  ;;  %s3066_s14 = scalar_lea.hbm %s3441_s7, %s2295_s13 }
  0x8d   : > { %s496_s30 = scalar_lea.vmem [#allocation9], %s2294_s3  ;;  %s2639_s2 = scalar_lea.hbm %s3066_s14, 9600 }
  0x8e   : > { %s503_s0 = sshll.u32 %s496_s30, 4  ;;  %p2640_p6 = scmp.ne.s32.totalorder %s3066_s14, %s2639_s2  ;;  %s3068_s0 = int_to_ptr.vmem [resolvable:$true] %s503_s0 }
  0x8f   : > { %p2645_p13 = scmp.lt.u32.totalorder %s3066_s14, %s3441_s7  ;;  %p2646_p2 = scmp.lt.u32.totalorder %s2644_s22, %s2639_s2 }
  0x90   : > { %p2642_p7 = pnand %p2640_p6, %p2991_p9  ;;  %p2648_p12 = scmp.lt.u32.totalorder %s2639_s2, %s3066_s14 }
  0x91   : > { %p2647_p3 = por %p2646_p2, %p2645_p13 }
  0x92   : > { %p2643_p5 = pneg %p2642_p7 }
  0x93   : > { %p2649_p1 = por %p2648_p12, %p2647_p3 }
  0x95   : > { %p2650_p4 = pnand %p2649_p1, %p2643_p5 }
  0x97   : > { %2653 = shalt.err (!%p2650_p4)
}
  0x98   : > { %s2654_s3 = scalar_lea.vmem %s3068_s0, 9600  ;;  %s2807_s13 = smov [#allocation9]  }
  0x99   : > { %p2655_p8 = scmp.ne.s32.totalorder %s3068_s0, %s2654_s3  ;;  %s2659_s16 = sshll.u32 %s2807_s13, 4  ;;  %s2660_s16 = int_to_ptr.vmem [resolvable:$false] %s2659_s16 }
  0x9a   : > { %s2661_s17 = scalar_lea.vmem %s2660_s16, 19200  ;;  %p2662_p6 = scmp.lt.s32.totalorder %s3068_s0, %s2660_s16 }
  0x9b   : > { %p2657_p0 = pnand %p2655_p8, %p2991_p9  ;;  %p2663_p7 = scmp.lt.s32.totalorder %s2661_s17, %s2654_s3 }
  0x9d   : > { %p2658_p10 = pneg %p2657_p0  ;;  %p2664_p13 = por %p2663_p7, %p2662_p6 }
  0x9f   : > { %p2665_p2 = pnand %p2664_p13, %p2658_p10 }
  0xa1   : > { %2668 = shalt.err (!%p2665_p2)
}
  0xa2   : > { %s2808_s30 = smov 192   ;;  %s2809_s2 = smov 12  }
  0xa3   : > { %2342 = dma.hbm_to_vmem [thread:$0]  (!%p3483_p11), %s3066_s14, 9600, %s3068_s0, %s2985_s27, %s2808_s30, %s2808_s30, %s2809_s2  }
  0xa4   : > { %s2297_s15 = smul.u32 48, %s2799_s28  ;;  %s524_s20 = scalar_lea.vmem [#allocation10], %s2296_s12 }
  0xa5   : > { %s532_s22 = sshll.u32 %s524_s20, 4  ;;  %s2810_s13 = smov [#allocation4]   ;;  %s3095_s22 = int_to_ptr.vmem [resolvable:$true] %s532_s22 }
  0xa6   : > { %s3102_s3 = scalar_lea.hbm %s3443_s9, %s2297_s15  ;;  %s408_s16 = sshll.u32 %s2810_s13, 4  ;;  %s409_s16 = int_to_ptr.vmem [resolvable:$true] %s408_s16 }
  0xa7   : > { %s2669_s17 = scalar_lea.hbm %s3102_s3, 48  ;;  %s2674_s30 = scalar_lea.hbm %s3443_s9, 144 }
  0xa8   : > { %p2670_p5 = scmp.ne.s32.totalorder %s3102_s3, %s2669_s17  ;;  %p2675_p1 = scmp.lt.u32.totalorder %s3102_s3, %s3443_s9 }
  0xa9   : > { %p2676_p4 = scmp.lt.u32.totalorder %s2674_s30, %s2669_s17  ;;  %p2678_p0 = scmp.lt.u32.totalorder %s2669_s17, %s3102_s3 }
  0xaa   : > { %p2672_p3 = pnand %p2670_p5, %p2991_p9 }
  0xab   : > { %p2677_p8 = por %p2676_p4, %p2675_p1 }
  0xac   : > { %p2673_p12 = pneg %p2672_p3 }
  0xad   : > { %p2679_p10 = por %p2678_p0, %p2677_p8 }
  0xaf   : > { %p2680_p6 = pnand %p2679_p10, %p2673_p12 }
  0xb1   : > { %2683 = shalt.err (!%p2680_p6)
}
  0xb2   : > { %s2684_s8 = scalar_lea.vmem %s3095_s22, 48  ;;  %s2811_s11 = smov [#allocation10]  }
  0xb3   : > { %p2685_p7 = scmp.ne.s32.totalorder %s3095_s22, %s2684_s8  ;;  %s2689_s13 = sshll.u32 %s2811_s11, 4  ;;  %s2690_s13 = int_to_ptr.vmem [resolvable:$false] %s2689_s13 }
  0xb4   : > { %s2691_s14 = scalar_lea.vmem %s2690_s13, 96  ;;  %p2692_p5 = scmp.lt.s32.totalorder %s3095_s22, %s2690_s13 }
  0xb5   : > { %p2687_p13 = pnand %p2685_p7, %p2991_p9  ;;  %p2693_p3 = scmp.lt.s32.totalorder %s2691_s14, %s2684_s8 }
  0xb7   : > { %p2688_p2 = pneg %p2687_p13  ;;  %p2694_p1 = por %p2693_p3, %p2692_p5 }
  0xb9   : > { %p2695_p4 = pnand %p2694_p1, %p2688_p2 }
  0xbb   : > { %2698 = shalt.err (!%p2695_p4)
}
  0xbc   : > { %2345 = dma.hbm_to_vmem [thread:$0]  (!%p3483_p11), %s3102_s3, 48, %s3095_s22, %s2985_s27  }
  0xbd   : > { %s2699_s30 = scalar_lea.hbm %s3435_s1, 128  ;;  %p3484_p8 = scmp.ne.s32.totalorder %s3475_s23, 0 }
  0xbe   : > { %p2700_p12 = scmp.ne.s32.totalorder %s3435_s1, %s2699_s30  ;;  %p2706_p7 = scmp.lt.u32.totalorder %s2699_s30, %s3435_s1 }
  0xbf   : > { %p3485_p0 = pneg %p3484_p8 }
  0xc1   : > { %p2702_p10 = pnand %p2700_p12, %p3485_p0 }
  0xc3   : > { %p2703_p6 = pneg %p2702_p10 }
  0xc5   : > { %p2708_p13 = pnand %p2706_p7, %p2703_p6 }
  0xc7   : > { %2711 = shalt.err (!%p2708_p13)
}
  0xc8   : > { %s2712_s22 = scalar_lea.vmem %s409_s16, 128  ;;  %p3486_p5 = pmov %p3485_p0 }
  0xc9   : > { %p2713_p2 = scmp.ne.s32.totalorder %s409_s16, %s2712_s22  ;;  %p2720_p4 = scmp.lt.s32.totalorder %s409_s16, %s409_s16 }
  0xca   : > { %p2721_p11 = scmp.lt.s32.totalorder %s2712_s22, %s2712_s22 }
  0xcb   : > { %p2715_p3 = pnand %p2713_p2, %p3486_p5 }
  0xcc   : > { %p2722_p9 = por %p2721_p11, %p2720_p4 }
  0xcd   : > { %p2716_p1 = pneg %p2715_p3 }
  0xcf   : > { %p2723_p0 = pnand %p2722_p9, %p2716_p1 }
  0xd1   : > { %2726 = shalt.err (!%p2723_p0)
}
  0xd2   : > { %2329 = dma.hbm_to_vmem [thread:$0]  (!%p3484_p8), %s3435_s1, 128, %s409_s16, [#allocation5]  }
  0xd3   : > { %s3151_s0 = scalar_lea.hbm %s3444_s10, %s2297_s15  ;;  %s543_s30 = scalar_lea.vmem [#allocation11], %s2296_s12 }
  0xd4   : > { %s551_s23 = sshll.u32 %s543_s30, 4  ;;  %s2727_s2 = scalar_lea.hbm %s3151_s0, 48  ;;  %s552_s23 = int_to_ptr.vmem [resolvable:$true] %s551_s23 }
  0xd5   : > { %p2728_p9 = scmp.ne.s32.totalorder %s3151_s0, %s2727_s2  ;;  %p3487_p11 = scmp.ne.s32.totalorder %s3480_s21, 0 }
  0xd6   : > { %s2732_s20 = scalar_lea.hbm %s3444_s10, 144  ;;  %p2733_p8 = scmp.lt.u32.totalorder %s3151_s0, %s3444_s10 }
  0xd7   : > { %p2730_p12 = pnand %p2728_p9, %p3487_p11  ;;  %p2734_p6 = scmp.lt.u32.totalorder %s2732_s20, %s2727_s2 }
  0xd8   : > { %p2736_p13 = scmp.lt.u32.totalorder %s2727_s2, %s3151_s0 }
  0xd9   : > { %p2731_p10 = pneg %p2730_p12  ;;  %p2735_p7 = por %p2734_p6, %p2733_p8 }
  0xdb   : > { %p2737_p2 = por %p2736_p13, %p2735_p7 }
  0xdd   : > { %p2738_p5 = pnand %p2737_p2, %p2731_p10 }
  0xdf   : > { %2741 = shalt.err (!%p2738_p5)
}
  0xe0   : > { %s2742_s25 = scalar_lea.vmem %s552_s23, 48  ;;  %s2812_s12 = smov [#allocation11]  }
  0xe1   : > { %p2743_p3 = scmp.ne.s32.totalorder %s552_s23, %s2742_s25  ;;  %s2747_s11 = sshll.u32 %s2812_s12, 4  ;;  %s2748_s11 = int_to_ptr.vmem [resolvable:$false] %s2747_s11 }
  0xe2   : > { %s2749_s22 = scalar_lea.vmem %s2748_s11, 96  ;;  %p2750_p0 = scmp.lt.s32.totalorder %s552_s23, %s2748_s11 }
  0xe3   : > { %p2745_p1 = pnand %p2743_p3, %p3487_p11  ;;  %p2751_p9 = scmp.lt.s32.totalorder %s2749_s22, %s2742_s25 }
  0xe5   : > { %p2746_p4 = pneg %p2745_p1  ;;  %p2752_p12 = por %p2751_p9, %p2750_p0 }
  0xe7   : > { %p2753_p6 = pnand %p2752_p12, %p2746_p4 }
  0xe9   : > { %2756 = shalt.err (!%p2753_p6)
}
  0xea   : > { %p3488_p8 = scmp.ne.s32.totalorder %s3476_s24, 0  ;;  %p3489_p10 = scmp.ne.s32.totalorder %s3474_s19, 0 }
  0xeb   : > { %p3490_p11 = scmp.eq.s32.totalorder (!%p3489_p10), %s2903_s29, 0 }
  0xec   : > { %2348 = dma.hbm_to_vmem [thread:$0]  (!%p3488_p8), %s3151_s0, 48, %s552_s23, %s2985_s27  }
  0xed   : > { %573 = sbr.rel (%p3489_p10) target bundleno = 1581 (0x62d), region = 72 }
  0xf4   : > { %2774 = dma.done.wait (%p3490_p11), [#allocation3], 128   ;;  %p3491_p7 = pmov %p3490_p11 }
  0xf6   : > { %2776 = vsyncadd (%p3491_p7), [#allocation3], 4294967168  ;;  %p3492_p13 = pmov %p3491_p7 }
  0xf7   : > { %p3493_p2 = pmov %p3491_p7 }
  0xf8   : > { %2778 = dma.done.wait (%p3492_p13), [#allocation5], 128  }
  0xf9   : > { %2780 = vsyncadd (%p3493_p2), [#allocation5], 4294967168  ;;  %s583_s24 = sand.u32 1, %s2903_s29   ;;  %s3185_s27 = sand.u32 1, %s2791_s26  }
  0xfa   : > { %s2156_s19 = sshll.u32 %s3185_s27, 5  ;;  %s584_s21 = scalar_lea.sflag [#allocation3], %s583_s24 }
  0xfb   : > { %s3188_s3 = scalar_lea.vmem [#allocation6], %s2156_s19  ;;  %p3494_p5 = scmp.ne.s32.totalorder %s3473_s18, 0 }
  0xfd   : > { %2782 = dma.done.wait (%p3494_p5), %s584_s21, 10528  }
  0xfe   : > { %2784 = vsyncadd (%p3494_p5), %s584_s21, 4294956768  ;;  %s2157_s13 = sshll.u32 %s3185_s27, 4  ;;  %v2813_v0 = vmov 0   ;;  %vm766_vm0 = vcmask 1043456   ;;  %v744_v3 = vld [vmem:[#allocation4] sm:$0xff]  ;;  %vm762_vm1 = vcmask 64512   ;;  %v969_v21 = vlaneseq }
  0xff   : > { %811 = vmatprep.mubr.bf16.mxu1 %v2813_v0  ;;  %s596_s14 = scalar_lea.vmem [#allocation7], %s2157_s13  ;;  %v745_v9 = vpack.c.bf16 %v744_v3, %v744_v3  ;;  %v2399_v11 = vld [vmem:[%s3188_s3 + $0x4] ss:$16 sps:$4 sm:$0xff]   ;;  %v2397_v12 = vld [vmem:[%s3188_s3] ss:$16 sps:$4 sm:$0xff]   ;;  %vm881_vm2 = vcmask 130048  }
 0x100   : > { %v750_v1 = vld [vmem:[%s596_s14] sm:$0xff]  ;;  %v751_v2 = vld [vmem:[%s596_s14 + $0x8] sm:$0xff]  ;;  %p718_p3 = scmp.lt.s32.totalorder %s2903_s29, 2  ;;  %v970_v22 = vshrl.u32 %v969_v21, 7  ;;  %s2300_s23 = smul.u32 600, %s3185_s27  ;;  %vm1798_vm10 = vcmask 359424  }
 0x101   : > { %v2163_v4 = vcombine.high %v750_v1, %v750_v1  ;;  %v2165_v5 = vcombine.high %v751_v2, %v751_v2  ;;  %v2162_v6 = vcombine.low %v750_v1, %v750_v1  ;;  %v2164_v7 = vcombine.low %v751_v2, %v751_v2  ;;  %v2402_v13 = vld [vmem:[%s3188_s3 + $0xc] ss:$16 sps:$4 sm:$0xff]   ;;  %v742_v14 = vld [vmem:[#allocation2] sm:$0xff]  ;;  %v2400_v16 = vld [vmem:[%s3188_s3 + $0x8] ss:$16 sps:$4 sm:$0xff]   ;;  %s2158_s16 = sshll.u32 %s3185_s27, 2 }
 0x102   : > { %v743_v15 = vpack.c.bf16 %v742_v14, %v742_v14  ;;  %s3505_s29 = smov (!%p718_p3, %s2903_s29), 2  ;;  %v3215_v27 = vsub.s32 0, %v970_v22  ;;  %v3217_v29 = vsub.s32 1, %v970_v22  ;;  %v3221_v39 = vsub.s32 2, %v970_v22  ;;  %s3241_s2 = scalar_lea.vmem [#allocation9], %s2300_s23 }
 0x103   : > { %2166 = vmatprep.subr.msk.bf16.mxu1 %vm766_vm0, %v2163_v4  ;;  %v768_v8 = vsel %vm766_vm0, %v2162_v6, 0  ;;  %v774_v10 = vsel %vm766_vm0, %v2164_v7, 0  ;;  %s2159_s18 = sshll.u32 %s3505_s29, 2  ;;  %v3223_v41 = vsub.s32 3, %v970_v22  ;;  %v2411_v14 = vld [vmem:[%s3241_s2 + $0x30] ss:$12 sps:$4 sm:$0xff]  }
 0x104   : > { %780 = vmatpush1.bf16.msra.mxu1 %v768_v8  ;;  %s721_s30 = scalar_lea.vmem %s3438_s4, %s2159_s18  ;;  %v2434_v21 = vld [vmem:[%s3241_s2 + $0xe0] ss:$12 sps:$4 sm:$0xff]   ;;  %v2418_v22 = vld [vmem:[%s3241_s2 + $0x7c] ss:$12 sps:$4 sm:$0xff]   ;;  %s725_s8 = scalar_lea.vmem %s3440_s6, %s2159_s18  ;;  %vm1893_vm11 = vcmask 7168  }
 0x105   : > { %2168 = vmatprep.subr.msk.bf16.mxu1 %vm766_vm0, %v2165_v5  ;;  %v967_v28 = vld [vmem:[%s721_s30] sm:$0xf]  ;;  %s605_s15 = scalar_lea.vmem [#allocation8], %s2158_s16  ;;  %s2302_s25 = smul.u32 3, %s3505_s29 }
 0x106   : > { %v972_v30 = vrot.slane %v967_v28, %v3215_v27  ;;  %v976_v32 = vrot.slane %v967_v28, %v3217_v29  ;;  %v980_v44 = vrot.slane %v967_v28, %v3221_v39  ;;  %v984_v46 = vrot.slane %v967_v28, %v3223_v41  ;;  %v2423_v28 = vld [vmem:[%s3241_s2 + $0x90] ss:$12 sps:$4 sm:$0xff]   ;;  %s3495_s22 = sld [smem:[#allocation21_spill]]  ;;  %s2301_s19 = smul.u32 3, %s3185_s27 }
 0x107   : > { %2167 = vmatmul.mubr.msk.bf16.vlgmr.msra.gmra.mrb[0].mxu1 %vm762_vm1, %v745_v9  ;;  %s3496_s13 = sld [smem:[#allocation22_spill]]  ;;  %s3497_s30 = sld [smem:[#allocation23_spill]] }
 0x108   : > { %821 = vmatpush1.bf16.msra.mxu1 %v774_v10  ;;  %852 = vmatprep.mubr.bf16.mxu1 %v2813_v0  ;;  %v2405_v10 = vld [vmem:[%s3241_s2] ss:$12 sps:$4 sm:$0xff]   ;;  %s623_s18 = scalar_lea.vmem [#allocation10], %s2301_s19  ;;  %s632_s17 = scalar_lea.vmem [#allocation11], %s2301_s19 }
 0x109   : > { %885 = vmatprep.subr.bf16.mxu1 %v2399_v11  ;;  %v2406_v11 = vld [vmem:[%s3241_s2 + $0x1c] ss:$12 sps:$4 sm:$0xff]   ;;  %s3498_s20 = sld [smem:[#allocation24_spill]] }
 0x10c   : > { %s729_s24 = scalar_lea.vmem %s3495_s22, %s2302_s25 }
 0x10d   : > { %s733_s14 = scalar_lea.vmem %s3496_s13, %s2302_s25  ;;  %s736_s23 = scalar_lea.vmem %s3497_s30, %s3505_s29 }
 0x10f   : > { %2169 = vmatmul.mubr.msk.bf16.vlgmr.msra.gmra.mrb[4].mxu1 %vm762_vm1, %v745_v9  ;;  %v2403_v9 = vld [vmem:[%s3241_s2 + $0x4] ss:$12 sps:$4 sm:$0xff]  }
 0x110   : > { %886 = vmatpush1.bf16.msra.mxu1 %v2397_v12  ;;  %917 = vmatprep.mubr.bf16.mxu1 %v2813_v0  ;;  %v2408_v12 = vld [vmem:[%s3241_s2 + $0x18] ss:$12 sps:$4 sm:$0xff]  }
 0x111   : > { %926 = vmatprep.subr.bf16.mxu1 %v2402_v13  ;;  %1618 = vmatprep.subr.bf16.mxu0 %v2403_v9  ;;  %v2409_v13 = vld [vmem:[%s3241_s2 + $0x34] ss:$12 sps:$4 sm:$0xff]   ;;  %v2464_v9 = vld [vmem:[%s3241_s2 + $0x170] ss:$12 sps:$4 sm:$0xff]  }
 0x112   : > { %1619 = vmatpush1.bf16.msra.mxu0 %v2405_v10  ;;  %v2465_v10 = vld [vmem:[%s3241_s2 + $0x168] ss:$12 sps:$4 sm:$0xff]  }
 0x113   : > { %1620 = vmatprep.subr.bf16.mxu0 %v2406_v11  ;;  %v2466_v11 = vld [vmem:[%s3241_s2 + $0xb0] ss:$12 sps:$4 sm:$0xff]  }
 0x116   : > { %1621 = vmatpush1.bf16.msra.mxu0 %v2408_v12  ;;  %v2469_v12 = vld [vmem:[%s3241_s2 + $0x184] ss:$12 sps:$4 sm:$0xff]  }
 0x117   : > { %2174 = vmatmul.mubr.msk.bf16.vlgmr.msra.gmra.mrb[8].mxu1 %vm881_vm2, %v743_v15  ;;  %1622 = vmatprep.subr.bf16.mxu0 %v2409_v13 }
 0x118   : > { %927 = vmatpush1.bf16.msra.mxu1 %v2400_v16  ;;  %958 = vmatprep.mubr.bf16.mxu1 %v2813_v0  ;;  %v2414_v16 = vld [vmem:[%s3241_s2 + $0x48] ss:$12 sps:$4 sm:$0xff]  }
 0x11a   : > { %1623 = vmatpush1.bf16.msra.mxu0 %v2411_v14 }
 0x11f   : > { %2175 = vmatmul.mubr.msk.bf16.vlgmr.msra.gmra.mrb[12].mxu1 %vm881_vm2, %v743_v15  ;;  %v2412_v15 = vld [vmem:[%s3241_s2 + $0x4c] ss:$12 sps:$4 sm:$0xff]  }
 0x120   : > { %1624 = vmatprep.subr.bf16.mxu0 %v2412_v15 }
 0x121   : > { %1625 = vmatpush1.bf16.msra.mxu0 %v2414_v16  ;;  %v3320_v16 = vld [vmem:[%s605_s15] sm:$0xf] }
 0x1da   : > { %v813_v17 = vpop.f32.mrb[0].mxu1 }
 0x1db   : > { %v815_v18 = vpop.f32.mrb[1].mxu1 }
 0x1dc   : > { %v817_v19 = vpop.f32.mrb[2].mxu1 }
 0x1dd   : > { %v818_v20 = vpop.f32.mrb[3].mxu1  ;;  %v2431_v19 = vld [vmem:[%s3241_s2 + $0x8] ss:$12 sps:$4 sm:$0xff]  }
 0x1de   : > { %v2417_v20 = vld [vmem:[%s3241_s2 + $0x60] ss:$12 sps:$4 sm:$0xff]  }
 0x1e2   : > { %v854_v23 = vpop.f32.mrb[4].mxu1 }
 0x1e3   : > { %v856_v24 = vpop.f32.mrb[5].mxu1 }
 0x1e4   : > { %v858_v25 = vpop.f32.mrb[6].mxu1 }
 0x1e5   : > { %v859_v26 = vpop.f32.mrb[7].mxu1  ;;  %v2421_v25 = vld [vmem:[%s3241_s2 + $0x94] ss:$12 sps:$4 sm:$0xff]  }
 0x1e6   : > { %v2439_v26 = vld [vmem:[%s3241_s2 + $0xf8] ss:$12 sps:$4 sm:$0xff]  }
 0x1ea   : > { %v919_v31 = vpop.f32.mrb[8].mxu1 }
 0x1eb   : > { %v920_v33 = vadd.f32 %v919_v31, %v813_v17  ;;  %v921_v34 = vpop.f32.mrb[9].mxu1  ;;  %v2415_v17 = vld [vmem:[%s3241_s2 + $0x64] ss:$12 sps:$4 sm:$0xff]   ;;  %v2426_v31 = vld [vmem:[%s3241_s2 + $0xa8] ss:$12 sps:$4 sm:$0xff]  }
 0x1ec   : > { %v922_v35 = vadd.f32 %v921_v34, %v815_v18  ;;  %v923_v36 = vpop.f32.mrb[10].mxu1  ;;  %v2429_v18 = vld [vmem:[%s3241_s2 + $0xc8] ss:$12 sps:$4 sm:$0xff]   ;;  %1626 = vmatprep.subr.bf16.mxu0 %v2415_v17 }
 0x1ed   : > { %v989_v37 = vadd.f32 %v972_v30, %v920_v33  ;;  %v924_v38 = vpop.f32.mrb[11].mxu1  ;;  %2266 = vmatprep.subr.bf16.mxu1 %v2429_v18  ;;  %1627 = vmatpush1.bf16.msra.mxu0 %v2417_v20  ;;  %v2424_v30 = vld [vmem:[%s3241_s2 + $0xac] ss:$12 sps:$4 sm:$0xff]   ;;  %v2432_v34 = vld [vmem:[%s3241_s2 + $0xdc] ss:$12 sps:$4 sm:$0xff]   ;;  %v1052_v18 = vrot.slane %v3320_v16, %v3217_v29  ;;  %v1060_v20 = vrot.slane %v3320_v16, %v3223_v41 }
 0x1ee   : > { %v990_v40 = vadd.f32 %v976_v32, %v922_v35  ;;  %2267 = vmatpush3.bf16.msra.mxu1 %v2431_v19  ;;  %1628 = vmatprep.subr.bf16.mxu0 %v2418_v22  ;;  %v2427_v32 = vld [vmem:[%s3241_s2 + $0xc4] ss:$12 sps:$4 sm:$0xff]   ;;  %v2430_v33 = vld [vmem:[%s3241_s2 + $0xc0] ss:$12 sps:$4 sm:$0xff]   ;;  %v1048_v19 = vrot.slane %v3320_v16, %v3215_v27 }
 0x1ef   : > { %v997_v42 = vmul.f32 1.442695, %v989_v37  ;;  %vm993_vm3 = vcmp.gt.f32.partialorder %v989_v37, 0.0  ;;  %2268 = vmatprep.subr.bf16.mxu1 %v2434_v21  ;;  %v2435_v35 = vld [vmem:[%s3241_s2 + $0xd8] ss:$12 sps:$4 sm:$0xff]  }
 0x1f0   : > { %v999_v43 = vmul.f32 1.442695, %v990_v40  ;;  %vm994_vm4 = vcmp.gt.f32.partialorder %v990_v40, 0.0  ;;  %v2437_v36 = vld [vmem:[%s3241_s2 + $0xf4] ss:$12 sps:$4 sm:$0xff]  }
 0x1f1   : > { %2503 = vpow2.f32 %v997_v42  ;;  %v3322_v17 = vld [vmem:[%s725_s8] sm:$0xf] }
 0x1f2   : > { %2505 = vpow2.f32 %v999_v43  ;;  %v960_v45 = vpop.f32.mrb[12].mxu1  ;;  %v1077_v22 = vrot.slane %v3322_v17, %v3217_v29 }
 0x1f3   : > { %v961_v47 = vadd.f32 %v960_v45, %v854_v23  ;;  %v962_v48 = vpop.f32.mrb[13].mxu1  ;;  %v2420_v23 = vld [vmem:[%s3241_s2 + $0x78] ss:$12 sps:$4 sm:$0xff]  }
 0x1f4   : > { %v963_v49 = vadd.f32 %v962_v48, %v856_v24  ;;  %v964_v50 = vpop.f32.mrb[14].mxu1  ;;  %v2436_v24 = vld [vmem:[%s3241_s2 + $0x20] ss:$12 sps:$4 sm:$0xff]   ;;  %1629 = vmatpush1.bf16.msra.mxu0 %v2420_v23 }
 0x1f5   : > { %v991_v51 = vadd.f32 %v980_v44, %v961_v47  ;;  %v965_v52 = vpop.f32.mrb[15].mxu1  ;;  %2269 = vmatpush3.bf16.msra.mxu1 %v2436_v24  ;;  %1630 = vmatprep.subr.bf16.mxu0 %v2421_v25  ;;  %v1073_v25 = vrot.slane %v3322_v17, %v3215_v27 }
 0x1f6   : > { %v992_v53 = vadd.f32 %v984_v46, %v963_v49  ;;  %2270 = vmatprep.subr.bf16.mxu1 %v2439_v26 }
 0x1f7   : > { %v1001_v54 = vmul.f32 1.442695, %v991_v51  ;;  %vm995_vm5 = vcmp.gt.f32.partialorder %v991_v51, 0.0 }
 0x1f8   : > { %v1003_v55 = vmul.f32 1.442695, %v992_v53  ;;  %vm996_vm6 = vcmp.gt.f32.partialorder %v992_v53, 0.0  ;;  %1631 = vmatpush1.bf16.msra.mxu0 %v2423_v28  ;;  %v1085_v28 = vrot.slane %v3322_v17, %v3223_v41 }
 0x1f9   : > { %2507 = vpow2.f32 %v1001_v54  ;;  %1632 = vmatprep.subr.bf16.mxu0 %v2424_v30  ;;  %v2441_v54 = vld [vmem:[%s3241_s2 + $0x38] ss:$12 sps:$4 sm:$0xff]  }
 0x1fa   : > { %2509 = vpow2.f32 %v1003_v55  ;;  %2271 = vmatpush3.bf16.msra.mxu1 %v2441_v54  ;;  %v2442_v55 = vld [vmem:[%s3241_s2 + $0x10c] ss:$12 sps:$4 sm:$0xff]   ;;  %v2486_v54 = vld [vmem:[%s3241_s2 + $0x1e8] ss:$12 sps:$4 sm:$0xff]  }
 0x1fb   : > { %v2504_v56 = vpop.eup %2503 }
 0x1fc   : > { %v2506_v57 = vpop.eup %2505  ;;  %v2176_v58 = vadd.f32 -1.0, %v2504_v56  ;;  %1633 = vmatpush1.bf16.msra.mxu0 %v2426_v31  ;;  %v2444_v56 = vld [vmem:[%s3241_s2 + $0x110] ss:$12 sps:$4 sm:$0xff]  }
 0x1fd   : > { %v2177_v59 = vadd.f32 -1.0, %v2506_v57  ;;  %1634 = vmatprep.subr.bf16.mxu0 %v2427_v32  ;;  %v2445_v57 = vld [vmem:[%s3241_s2 + $0x108] ss:$12 sps:$4 sm:$0xff]   ;;  %2272 = vmatprep.subr.bf16.mxu1 %v2444_v56  ;;  %v2487_v56 = vld [vmem:[%s3241_s2 + $0x1f8] ss:$12 sps:$4 sm:$0xff]  }
 0x1fe   : > { %v3227_v60 = vsel %vm993_vm3, %v989_v37, %v2176_v58  ;;  %v2446_v58 = vld [vmem:[%s3241_s2 + $0x50] ss:$12 sps:$4 sm:$0xff]  }
 0x1ff   : > { %v3229_v61 = vsel %vm994_vm4, %v990_v40, %v2177_v59  ;;  %2273 = vmatpush3.bf16.msra.mxu1 %v2446_v58  ;;  %v2447_v59 = vld [vmem:[%s3241_s2 + $0x124] ss:$12 sps:$4 sm:$0xff]   ;;  %v2493_v58 = vld [vmem:[%s3241_s2 + $0x214] ss:$12 sps:$4 sm:$0xff]  }
 0x200   : > { %v1015_v3 = vadd.f32 %v3229_v61, %v3227_v60  ;;  %1635 = vmatpush1.bf16.msra.mxu0 %v2430_v33 }
 0x201   : > { %1636 = vmatprep.subr.bf16.mxu0 %v2432_v34 }
 0x203   : > { %v2508_v62 = vpop.eup %2507 }
 0x204   : > { %v2510_v63 = vpop.eup %2509  ;;  %v2178_v1 = vadd.f32 -1.0, %v2508_v62  ;;  %1637 = vmatpush1.bf16.msra.mxu0 %v2435_v35  ;;  %v2451_v62 = vld [vmem:[%s3241_s2 + $0x68] ss:$12 sps:$4 sm:$0xff]  }
 0x205   : > { %v2179_v2 = vadd.f32 -1.0, %v2510_v63  ;;  %1638 = vmatprep.subr.bf16.mxu0 %v2437_v36  ;;  %v2452_v63 = vld [vmem:[%s3241_s2 + $0x13c] ss:$12 sps:$4 sm:$0xff]  }
 0x206   : > { %v3233_v4 = vsel %vm995_vm5, %v991_v51, %v2178_v1  ;;  %v2454_v1 = vld [vmem:[%s3241_s2 + $0x140] ss:$12 sps:$4 sm:$0xff]  }
 0x207   : > { %v3235_v5 = vsel %vm996_vm6, %v992_v53, %v2179_v2  ;;  %v1016_v6 = vadd.f32 %v1015_v3, %v3233_v4  ;;  %v2440_v53 = vld [vmem:[%s3241_s2 + $0xf0] ss:$12 sps:$4 sm:$0xff]   ;;  %v2455_v2 = vld [vmem:[%s3241_s2 + $0x138] ss:$12 sps:$4 sm:$0xff]   ;;  %v2456_v3 = vld [vmem:[%s3241_s2 + $0x80] ss:$12 sps:$4 sm:$0xff]  }
 0x208   : > { %v1017_v7 = vsel %vm881_vm2, %v3235_v5, 0.0  ;;  %1639 = vmatpush1.bf16.msra.mxu0 %v2440_v53  ;;  %v2483_v53 = vld [vmem:[%s3241_s2 + $0x1e0] ss:$12 sps:$4 sm:$0xff]  }
 0x209   : > { %v1018_v8 = vadd.f32 %v1017_v7, %v1016_v6  ;;  %1640 = vmatprep.subr.bf16.mxu0 %v2442_v55  ;;  %v2460_v6 = vld [vmem:[%s3241_s2 + $0x150] ss:$12 sps:$4 sm:$0xff]   ;;  %v2461_v7 = vld [vmem:[%s3241_s2 + $0x98] ss:$12 sps:$4 sm:$0xff]  }
 0x20a   : > { %v2489_v55 = vld [vmem:[%s3241_s2 + $0x1fc] ss:$12 sps:$4 sm:$0xff]  }
 0x20b   : > { %1019 = vadd.xlane.f32.xlu0 %v1018_v8  ;;  %v2462_v8 = vld [vmem:[%s3241_s2 + $0x16c] ss:$12 sps:$4 sm:$0xff]  }
 0x20c   : > { %1641 = vmatpush1.bf16.msra.mxu0 %v2445_v57  ;;  %v2490_v57 = vld [vmem:[%s3241_s2 + $0x200] ss:$12 sps:$4 sm:$0xff]  }
 0x20d   : > { %1642 = vmatprep.subr.bf16.mxu0 %v2447_v59  ;;  %v2491_v59 = vld [vmem:[%s3241_s2 + $0x210] ss:$12 sps:$4 sm:$0xff]  }
 0x298   : > { %v1020_v37 = vpop.xlane.xlu0 %1019 }
 0x299   : > { %v1022_v38 = vmul.f32 0.0025, %v1020_v37  ;;  %v2467_v37 = vld [vmem:[%s3241_s2 + $0x180] ss:$12 sps:$4 sm:$0xff]  }
 0x29b   : > { %v3270_v40 = vsub.f32 %v3227_v60, %v1022_v38  ;;  %v3273_v42 = vsub.f32 %v3229_v61, %v1022_v38  ;;  %v3276_v43 = vsub.f32 %v3233_v4, %v1022_v38  ;;  %v3279_v44 = vsub.f32 %v3235_v5, %v1022_v38  ;;  %v2449_v60 = vld [vmem:[%s3241_s2 + $0x128] ss:$12 sps:$4 sm:$0xff]   ;;  %v2450_v61 = vld [vmem:[%s3241_s2 + $0x120] ss:$12 sps:$4 sm:$0xff]   ;;  %v2459_v5 = vld [vmem:[%s3241_s2 + $0x158] ss:$12 sps:$4 sm:$0xff]  }
 0x29c   : > { %2274 = vmatprep.subr.bf16.mxu1 %v2449_v60  ;;  %1643 = vmatpush1.bf16.msra.mxu0 %v2450_v61  ;;  %v2457_v4 = vld [vmem:[%s3241_s2 + $0x154] ss:$12 sps:$4 sm:$0xff]   ;;  %v2494_v60 = vld [vmem:[%s3241_s2 + $0x218] ss:$12 sps:$4 sm:$0xff]  }
 0x29d   : > { %v1027_v45 = vmul.f32 %v3270_v40, %v3270_v40  ;;  %v1028_v46 = vmul.f32 %v3273_v42, %v3273_v42  ;;  %v1030_v47 = vmul.f32 %v3279_v44, %v3279_v44  ;;  %v1029_v48 = vmul.f32 %v3276_v43, %v3276_v43  ;;  %2275 = vmatpush3.bf16.msra.mxu1 %v2451_v62  ;;  %v2497_v61 = vld [vmem:[%s3241_s2 + $0x22c] ss:$12 sps:$4 sm:$0xff]  }
 0x29e   : > { %1644 = vmatprep.subr.bf16.mxu0 %v2452_v63  ;;  %2276 = vmatprep.subr.bf16.mxu1 %v2454_v1  ;;  %v1056_v63 = vrot.slane %v3320_v16, %v3221_v39  ;;  %v2495_v1 = vld [vmem:[%s3241_s2 + $0x228] ss:$12 sps:$4 sm:$0xff]  }
 0x29f   : > { %v1031_v49 = vadd.f32 %v1028_v46, %v1027_v45  ;;  %v1033_v51 = vsel %vm881_vm2, %v1030_v47, 0.0  ;;  %v2474_v45 = vld [vmem:[%s3241_s2 + $0x1a0] ss:$12 sps:$4 sm:$0xff]   ;;  %v2475_v47 = vld [vmem:[%s3241_s2 + $0x1b0] ss:$12 sps:$4 sm:$0xff]  }
 0x2a0   : > { %1645 = vmatpush1.bf16.msra.mxu0 %v2455_v2  ;;  %v2477_v46 = vld [vmem:[%s3241_s2 + $0x1b4] ss:$12 sps:$4 sm:$0xff]   ;;  %v2498_v2 = vld [vmem:[%s3241_s2 + $0x230] ss:$12 sps:$4 sm:$0xff]  }
 0x2a1   : > { %v1032_v50 = vadd.f32 %v1031_v49, %v1029_v48  ;;  %2277 = vmatpush3.bf16.msra.mxu1 %v2456_v3  ;;  %1646 = vmatprep.subr.bf16.mxu0 %v2457_v4  ;;  %v2478_v48 = vld [vmem:[%s3241_s2 + $0x1b8] ss:$12 sps:$4 sm:$0xff]  }
 0x2a2   : > { %2278 = vmatprep.subr.bf16.mxu1 %v2459_v5  ;;  %v2481_v49 = vld [vmem:[%s3241_s2 + $0x1cc] ss:$12 sps:$4 sm:$0xff]   ;;  %v2501_v3 = vld [vmem:[%s3241_s2 + $0x244] ss:$12 sps:$4 sm:$0xff]   ;;  %v1081_v5 = vrot.slane %v3322_v17, %v3221_v39 }
 0x2a3   : > { %v1034_v52 = vadd.f32 %v1033_v51, %v1032_v50  ;;  %v2479_v50 = vld [vmem:[%s3241_s2 + $0x1c8] ss:$12 sps:$4 sm:$0xff]   ;;  %v2482_v51 = vld [vmem:[%s3241_s2 + $0x1d0] ss:$12 sps:$4 sm:$0xff]  }
 0x2a4   : > { %1647 = vmatpush1.bf16.msra.mxu0 %v2460_v6  ;;  %v2499_v6 = vld [vmem:[%s3241_s2 + $0x240] ss:$12 sps:$4 sm:$0xff]  }
 0x2a5   : > { %1035 = vadd.xlane.f32.xlu0 %v1034_v52  ;;  %2279 = vmatpush3.bf16.msra.mxu1 %v2461_v7  ;;  %v2485_v52 = vld [vmem:[%s3241_s2 + $0x1e4] ss:$12 sps:$4 sm:$0xff]  }
 0x2a6   : > { %1648 = vmatprep.subr.bf16.mxu0 %v2462_v8  ;;  %2280 = vmatprep.subr.bf16.mxu1 %v2464_v9 }
 0x2a8   : > { %1649 = vmatpush1.bf16.msra.mxu0 %v2465_v10 }
 0x2a9   : > { %2281 = vmatpush3.bf16.msra.mxu1 %v2466_v11  ;;  %1659 = vmatprep.subr.bf16.mxu0 %v2469_v12 }
 0x2aa   : > { %1740 = vmatprep.subr.bf16.mxu1 %v2813_v0 }
 0x332   : > { %v1036_v13 = vpop.xlane.xlu0 %1035 }
 0x333   : > { %v1037_v14 = vmul.f32 0.0025, %v1036_v13 }
 0x335   : > { %v1038_v15 = vadd.f32 1e-05, %v1037_v14  ;;  %v1198_v14 = vld [vmem:[%s729_s24] sm:$0x7] }
 0x336   : > { %v1207_v16 = vrot.slane %v1198_v14, %v3217_v29 }
 0x337   : > { %2511 = vrsqrt.f32 %v1038_v15  ;;  %v1203_v15 = vrot.slane %v1198_v14, %v3215_v27 }
 0x341   : > { %v3330_v21 = vpop.eup %2511 }
 0x342   : > { %v1041_v23 = vmul.f32 %v3330_v21, %v3273_v42  ;;  %v1040_v24 = vmul.f32 %v3330_v21, %v3270_v40  ;;  %v1043_v26 = vmul.f32 %v3330_v21, %v3279_v44  ;;  %v2470_v40 = vld [vmem:[%s3241_s2 + $0x188] ss:$12 sps:$4 sm:$0xff]   ;;  %v2471_v44 = vld [vmem:[%s3241_s2 + $0x198] ss:$12 sps:$4 sm:$0xff]   ;;  %v1042_v62 = vmul.f32 %v3330_v21, %v3276_v43 }
 0x343   : > { %v2473_v42 = vld [vmem:[%s3241_s2 + $0x19c] ss:$12 sps:$4 sm:$0xff]  }
 0x344   : > { %v1066_v30 = vmul.f32 %v1052_v18, %v1041_v23  ;;  %v1065_v31 = vmul.f32 %v1048_v19, %v1040_v24  ;;  %v1068_v32 = vmul.f32 %v1060_v20, %v1043_v26  ;;  %v1067_v4 = vmul.f32 %v1056_v63, %v1042_v62  ;;  %v2502_v43 = vld [vmem:[%s3241_s2 + $0x248] ss:$12 sps:$4 sm:$0xff]   ;;  %v1795_v62 = vld [vmem:[%s623_s18] sm:$0x7]  ;;  %s2161_s2 = sshll.u32 %s3505_s29, 3 }
 0x345   : > { %v1796_v63 = vld [vmem:[%s632_s17] sm:$0x7]  ;;  %s740_s8 = scalar_lea.vmem %s3498_s20, %s2161_s2 }
 0x346   : > { %v1091_v33 = vadd.f32 %v1077_v22, %v1066_v30  ;;  %v1090_v34 = vadd.f32 %v1073_v25, %v1065_v31  ;;  %v1093_v35 = vadd.f32 %v1085_v28, %v1068_v32  ;;  %v1092_v7 = vadd.f32 %v1081_v5, %v1067_v4  ;;  %v1860_v4 = vld [vmem:[%s733_s14] sm:$0x7] }
 0x348   : > { %v1095_v36 = vpack.c.bf16 %v1091_v33, %v1091_v33  ;;  %v1094_v38 = vpack.c.bf16 %v1090_v34, %v1090_v34  ;;  %v1097_v41 = vpack.c.bf16 %v1093_v35, %v1093_v35  ;;  %v1096_v8 = vpack.c.bf16 %v1092_v7, %v1092_v7 }
 0x34a   : > { %1650 = vmatprep.mubr.bf16.mxu0 %v1095_v36  ;;  %1732 = vmatprep.mubr.bf16.mxu1 %v1095_v36 }
 0x34b   : > { %1651 = vmatmul.mubr.bf16.vlgmr.msra.gmra.mrb[0].mxu0 %v1094_v38  ;;  %1733 = vmatmul.mubr.bf16.vlgmr.msra.gmra.mrb[16].mxu1 %v1094_v38 }
 0x34c   : > { %1660 = vmatpush1.bf16.msra.mxu0 %v2467_v37  ;;  %1741 = vmatpush1.bf16.msra.mxu1 %v2470_v40 }
 0x34d   : > { %2255 = vmatprep.mubr.msk.bf16.mxu0 %vm881_vm2, %v1097_v41  ;;  %2256 = vmatprep.mubr.msk.bf16.mxu1 %vm881_vm2, %v1097_v41 }
 0x34e   : > { %1661 = vmatprep.subr.bf16.mxu0 %v2473_v42  ;;  %1742 = vmatprep.subr.bf16.mxu1 %v2813_v0 }
 0x350   : > { %1662 = vmatpush1.bf16.msra.mxu0 %v2471_v44  ;;  %1743 = vmatpush1.bf16.msra.mxu1 %v2474_v45 }
 0x351   : > { %1663 = vmatprep.subr.bf16.mxu0 %v2477_v46  ;;  %1744 = vmatprep.subr.bf16.mxu1 %v2813_v0 }
 0x354   : > { %1664 = vmatpush1.bf16.msra.mxu0 %v2475_v47  ;;  %1745 = vmatpush1.bf16.msra.mxu1 %v2478_v48 }
 0x355   : > { %1665 = vmatprep.subr.bf16.mxu0 %v2481_v49  ;;  %1746 = vmatprep.subr.bf16.mxu1 %v2813_v0 }
 0x358   : > { %1666 = vmatpush1.bf16.msra.mxu0 %v2479_v50  ;;  %1747 = vmatpush1.bf16.msra.mxu1 %v2482_v51 }
 0x359   : > { %1667 = vmatprep.subr.bf16.mxu0 %v2485_v52  ;;  %1748 = vmatprep.subr.bf16.mxu1 %v2813_v0 }
 0x35c   : > { %1668 = vmatpush1.bf16.msra.mxu0 %v2483_v53  ;;  %1749 = vmatpush1.bf16.msra.mxu1 %v2486_v54 }
 0x35d   : > { %1669 = vmatprep.subr.bf16.mxu0 %v2489_v55  ;;  %1750 = vmatprep.subr.bf16.mxu1 %v2813_v0 }
 0x360   : > { %1670 = vmatpush1.bf16.msra.mxu0 %v2487_v56  ;;  %1751 = vmatpush1.bf16.msra.mxu1 %v2490_v57 }
 0x361   : > { %1671 = vmatprep.subr.bf16.mxu0 %v2493_v58  ;;  %1752 = vmatprep.subr.bf16.mxu1 %v2813_v0 }
 0x364   : > { %1672 = vmatpush1.bf16.msra.mxu0 %v2491_v59  ;;  %1753 = vmatpush1.bf16.msra.mxu1 %v2494_v60 }
 0x365   : > { %1673 = vmatprep.subr.bf16.mxu0 %v2497_v61  ;;  %1754 = vmatprep.subr.bf16.mxu1 %v2813_v0 }
 0x368   : > { %1674 = vmatpush1.bf16.msra.mxu0 %v2495_v1  ;;  %1755 = vmatpush1.bf16.msra.mxu1 %v2498_v2  ;;  %v1826_v1 = vrot.slane %v1795_v62, %v3215_v27  ;;  %v1830_v2 = vrot.slane %v1795_v62, %v3217_v29 }
 0x369   : > { %1675 = vmatprep.subr.bf16.mxu0 %v2501_v3  ;;  %1756 = vmatprep.subr.bf16.mxu1 %v2813_v0  ;;  %v1211_v0 = vrot.slane %v1198_v14, %v3221_v39  ;;  %v1834_v3 = vrot.slane %v1795_v62, %v3221_v39 }
 0x36c   : > { %1676 = vmatpush1.bf16.msra.mxu0 %v2499_v6  ;;  %1757 = vmatpush1.bf16.msra.mxu1 %v2502_v43  ;;  %v1845_v6 = vrot.slane %v1796_v63, %v3215_v27  ;;  %v1849_v43 = vrot.slane %v1796_v63, %v3217_v29 }
 0x36f   : > { %1692 = vmatmul.mubr.bf16.vlgmr.msra.gmra.mrb[0].mxu0 %v1096_v8  ;;  %1773 = vmatmul.mubr.bf16.vlgmr.msra.gmra.mrb[20].mxu1 %v1096_v8 }
 0x41e   : > { %v2282_v9 = vpop.f32.mrb[16].mxu1 }
 0x41f   : > { %v2283_v10 = vpop.f32.mrb[17].mxu1 }
 0x420   : > { %v2284_v11 = vadd.f32 %v2283_v10, %v2282_v9  ;;  %v2285_v12 = vpop.f32.mrb[18].mxu1  ;;  %v1853_v10 = vrot.slane %v1796_v63, %v3221_v39 }
 0x421   : > { %v2286_v13 = vpop.f32.mrb[19].mxu1  ;;  %v1869_v12 = vrot.slane %v1860_v4, %v3217_v29 }
 0x422   : > { %v1735_v17 = vadd.f32 %v2284_v11, %v1211_v0  ;;  %v1865_v11 = vrot.slane %v1860_v4, %v3215_v27  ;;  %v2260_v27 = vld [vmem:[%s736_s23] ss:$0 sm:$0xff] }
 0x442   : > { %v1693_v18 = vpop.f32.mrb[0].mxu0  ;;  %v1774_v19 = vpop.f32.mrb[20].mxu1 }
 0x443   : > { %v2288_v20 = vadd.f32 %v1693_v18, %v1203_v15  ;;  %v1775_v21 = vadd.f32 %v1774_v19, %v1735_v17  ;;  %v1695_v22 = vpop.f32.mrb[1].mxu0  ;;  %v1776_v23 = vpop.f32.mrb[21].mxu1  ;;  %v1873_v15 = vrot.slane %v1860_v4, %v3221_v39 }
 0x444   : > { %v2289_v24 = vadd.f32 %v1695_v22, %v1207_v16  ;;  %v1697_v25 = vpop.f32.mrb[2].mxu0  ;;  %v1777_v26 = vpop.f32.mrb[22].mxu1 }
 0x445   : > { %v1783_v28 = vmul.f32 1.442695, %v2288_v20  ;;  %v1787_v30 = vmul.f32 1.442695, %v1775_v21  ;;  %v1698_v31 = vpop.f32.mrb[3].mxu0  ;;  %v1778_v33 = vpop.f32.mrb[23].mxu1 }
 0x446   : > { %v1785_v32 = vmul.f32 1.442695, %v2289_v24  ;;  %vm1780_vm7 = vcmp.gt.f32.partialorder %v2288_v20, 0.0  ;;  %vm1782_vm8 = vcmp.gt.f32.partialorder %v1775_v21, 0.0  ;;  %vm1781_vm9 = vcmp.gt.f32.partialorder %v2289_v24, 0.0 }
 0x447   : > { %2513 = vpow2.f32 %v1783_v28 }
 0x448   : > { %2515 = vpow2.f32 %v1787_v30 }
 0x449   : > { %2517 = vpow2.f32 %v1785_v32 }
 0x451   : > { %v2514_v34 = vpop.eup %2513 }
 0x452   : > { %v2516_v35 = vpop.eup %2515  ;;  %v2257_v36 = vadd.f32 -1.0, %v2514_v34 }
 0x453   : > { %v2518_v37 = vpop.eup %2517  ;;  %v2259_v38 = vadd.f32 -1.0, %v2516_v35 }
 0x454   : > { %v2258_v40 = vadd.f32 -1.0, %v2518_v37  ;;  %v1792_v42 = vsel %vm1780_vm7, %v2288_v20, %v2257_v36 }
 0x455   : > { %v1794_v41 = vsel %vm1782_vm8, %v1775_v21, %v2259_v38 }
 0x456   : > { %v1793_v44 = vsel %vm1781_vm9, %v2289_v24, %v2258_v40  ;;  %v1799_v46 = vsel %vm1798_vm10, %v1794_v41, 0.0 }
 0x457   : > { %v1797_v45 = vadd.f32 %v1793_v44, %v1792_v42 }
 0x459   : > { %v1800_v47 = vadd.f32 %v1799_v46, %v1797_v45 }
 0x45b   : > { %1801 = vadd.xlane.f32.xlu1 %v1800_v47 }
 0x4e8   : > { %v1802_v48 = vpop.xlane.xlu1 %1801 }
 0x4e9   : > { %v1804_v49 = vmul.f32 0.0033333334, %v1802_v48 }
 0x4eb   : > { %v1805_v50 = vsub.f32 %v1792_v42, %v1804_v49  ;;  %v1806_v51 = vsub.f32 %v1793_v44, %v1804_v49  ;;  %v1807_v52 = vsub.f32 %v1794_v41, %v1804_v49 }
 0x4ed   : > { %v1808_v53 = vmul.f32 %v1805_v50, %v1805_v50  ;;  %v1809_v54 = vmul.f32 %v1806_v51, %v1806_v51  ;;  %v1810_v55 = vmul.f32 %v1807_v52, %v1807_v52 }
 0x4ef   : > { %v1811_v56 = vadd.f32 %v1809_v54, %v1808_v53  ;;  %v1812_v57 = vsel %vm1798_vm10, %v1810_v55, 0.0 }
 0x4f1   : > { %v1813_v58 = vadd.f32 %v1812_v57, %v1811_v56 }
 0x4f3   : > { %1814 = vadd.xlane.f32.xlu1 %v1813_v58 }
 0x580   : > { %v1815_v59 = vpop.xlane.xlu1 %1814 }
 0x581   : > { %v1816_v60 = vmul.f32 0.0033333334, %v1815_v59 }
 0x583   : > { %v1817_v61 = vadd.f32 1e-05, %v1816_v60 }
 0x585   : > { %2519 = vrsqrt.f32 %v1817_v61 }
 0x58f   : > { %v2520_v5 = vpop.eup %2519 }
 0x590   : > { %v1819_v7 = vmul.f32 %v2520_v5, %v1805_v50  ;;  %v1820_v8 = vmul.f32 %v2520_v5, %v1806_v51  ;;  %v1821_v9 = vmul.f32 %v2520_v5, %v1807_v52 }
 0x592   : > { %v1838_v13 = vmul.f32 %v1826_v1, %v1819_v7  ;;  %v1839_v14 = vmul.f32 %v1830_v2, %v1820_v8  ;;  %v1840_v0 = vmul.f32 %v1834_v3, %v1821_v9 }
 0x594   : > { %v1857_v16 = vadd.f32 %v1845_v6, %v1838_v13  ;;  %v1858_v17 = vadd.f32 %v1849_v43, %v1839_v14  ;;  %v1859_v18 = vadd.f32 %v1853_v10, %v1840_v0 }
 0x596   : > { %v1877_v19 = vmul.f32 %v1865_v11, %v1857_v16  ;;  %v1878_v20 = vmul.f32 %v1869_v12, %v1858_v17  ;;  %v1879_v21 = vmul.f32 %v1873_v15, %v1859_v18 }
 0x598   : > { %v1880_v22 = vadd.f32 %v1878_v20, %v1877_v19  ;;  %v1881_v23 = vsel %vm1798_vm10, %v1879_v21, 0.0 }
 0x59a   : > { %v1882_v24 = vadd.f32 %v1881_v23, %v1880_v22 }
 0x59c   : > { %1883 = vadd.xlane.f32.xlu0 %v1882_v24 }
 0x629   : > { %v1884_v29 = vpop.xlane.xlu0 %1883 }
 0x62a   : > { %v1892_v39 = vadd.f32 %v2260_v27, %v1884_v29 }
 0x62c   : > { %1894 = vst.msk [vmem:[%s740_s8] sm:$0xff] %vm1893_vm11, %v1892_v39 }
 0x62d PF: > { %s3499_s28 = sld [smem:[#allocation16_spill]]  ;;  %s3500_s15 = sld [smem:[#allocation15_spill]] }
 0x62e   : > { %s3501_s27 = sld [smem:[#allocation17_spill]]  ;;  %s3502_s25 = smov %s2791_s26 }
 0x633   : > { %p22_p1 = scmp.ge.s32.totalorder %s3499_s28, 5   ;;  %s3503_s26 = smov %s3500_s15 }
 0x635   :  { %24 = sbr.rel (!%p22_p1) target bundleno = 11 (0xb), region = 189 }
 0x63c   :  { %1914 = vsyncpa [#allocation3], 1 }
 0x63d   :  { %1916 = vsyncpa [#allocation3 + $0x1], 1 }
 0x63e   :  { %1917 = vsyncpa [#allocation5], 1 }

</bundles_post_ra>
